<compile_context>
chip_gen: v7x
topology: tpu7x:2x2x1
jax: 0.10.0
libtpu: 0.0.40
codegen_flags: <defaults>
</compile_context>

<pallas_src>
import functools

import numpy as np

import jax
import jax.numpy as jnp
from jax.experimental import pallas as pl
from jax.experimental.pallas import tpu as pltpu


# ----------------------------------------------------------------------------
# Kernels
# ----------------------------------------------------------------------------
def gcn_layer_kernel(blk_ref, cnt_ref, a_ref, h_ref, dis_ref, w_ref, b_ref,
                     out_ref, acc_ref, *, scale_output):
    """One fused GCNConv + BatchNorm + ReLU layer (block-sparse over A tiles).

    Grid = (row tiles "parallel", nonzero-K-tiles "arbitrary").
      acc[i]  += A[i, blk[i,k]] @ h_pre[blk[i,k]]       (bf16 MXU, gated on k < cnt[i])
      out[i]   = relu((acc[i] * deg^-1/2[i]) @ W' + b')  at last k
                 (optionally * deg^-1/2[i] again, pre-scaling for the next layer)
    h_pre is already column-scaled by deg^-1/2; W'/b' have conv bias + BN folded in.
    """
    i = pl.program_id(0)
    k = pl.program_id(1)

    @pl.when(k == 0)
    def _():
        acc_ref[...] = jnp.zeros_like(acc_ref)

    @pl.when(k < cnt_ref[i])
    def _():
        # bf16 x bf16 -> f32 accumulate: native full-rate MXU path.
        acc_ref[...] += jnp.dot(a_ref[...], h_ref[...].astype(jnp.bfloat16),
                                preferred_element_type=jnp.float32)

    @pl.when(k == pl.num_programs(1) - 1)
    def _():
        agg = acc_ref[...] * dis_ref[...]                      # (tm, f_in) * (tm, 1)
        z = jnp.dot(agg, w_ref[...], preferred_element_type=jnp.float32) + b_ref[...]
        h_out = jnp.maximum(z, 0.0)
        if scale_output:                                       # pre-scale for next layer
            h_out = h_out * dis_ref[...]
        out_ref[...] = h_out


def head_kernel(p_ref, h_ref, wm1_ref, bm1_ref, wm2_ref, bm2_ref, out_ref):
    """global_mean_pool -> mlp1 -> mlp2 -> log_softmax (tiny, fully resident)."""
    f32 = jnp.float32
    g = jnp.dot(p_ref[...], h_ref[...], preferred_element_type=f32)
    g = jnp.dot(g, wm1_ref[...], preferred_element_type=f32) + bm1_ref[...]
    z = jnp.dot(g, wm2_ref[...], preferred_element_type=f32) + bm2_ref[...]
    m = jnp.max(z, axis=1, keepdims=True)
    lse = jnp.log(jnp.sum(jnp.exp(z - m), axis=1, keepdims=True)) + m
    out_ref[...] = z - lse


# ----------------------------------------------------------------------------
# Host-side sizing helpers (chip-aware VMEM budget, lane-padding-aware footprint)
# ----------------------------------------------------------------------------
def _round_up(x, m):
    return ((x + m - 1) // m) * m


def _buf_bytes(rows, cols, itemsize):
    """VMEM bytes of a (rows, cols) buffer with sublane/lane padding."""
    return _round_up(max(rows, 1), 8) * _round_up(max(cols, 1), 128) * itemsize


def _layer_footprint(tm, tk, f_in, f_out):
    return (2 * _buf_bytes(tm, tk, 2)                    # A tiles (bf16, double-buffered)
            + 2 * _buf_bytes(tk, f_in, 4)                # h tiles
            + 2 * _buf_bytes(tm, 1, 4)                   # deg^-1/2 rows (pads to 128 lanes)
            + 2 * _buf_bytes(tm, f_out, 4)               # out tiles
            + _buf_bytes(tm, f_in, 4)                    # f32 accumulator scratch
            + 2 * (_buf_bytes(f_in, f_out, 4) + _buf_bytes(1, f_out, 4)))  # W', shift'


def _vmem_budget():
    cap = 64 << 20
    try:
        cap = int(getattr(pltpu.get_tpu_info(), "vmem_capacity_bytes", cap))
    except Exception:
        pass
    if cap >= (128 << 20):
        return 100 << 20     # v5e / v6e: 128 MiB physical VMEM
    return 48 << 20          # v7x: 64 MiB physical -> leave Mosaic scratch headroom


def choose_tiles(n_nodes, f_in, f_out, budget):
    """Largest (tm, tk) tiles that fit the VMEM budget; keep >=2 row tiles when
    possible so the 'parallel' axis shards across both v7x TensorCores."""
    n_base = _round_up(n_nodes, 128)
    tm_cap = n_base if n_base < 256 else n_base // 2
    for tk in (2048, 1024, 512, 256, 128):
        if tk > n_base:
            continue
        for tm in (1024, 512, 256, 128):
            if tm > tm_cap:
                continue
            if _layer_footprint(tm, tk, f_in, f_out) + (4 << 20) <= budget:
                return tm, tk
    return 128, 128


# ----------------------------------------------------------------------------
# Graph-static operators (built once, cacheable; host-side numpy)
# ----------------------------------------------------------------------------
def build_graph_operators(edge_index, batch, n_nodes, n_graphs, tm, tk):
    """Returns:
       A       : (N_pad, N_pad) bf16 edge-count adjacency incl. self loops
       dis     : (N_pad, 1)     f32  deg^-1/2 (0 on padded rows)
       P       : (G, N_pad)     f32  global-mean-pool matrix
       blk     : (nrt*max_cnt,) i32  flat block-CSR: nonzero K-tile ids per row tile
       cnt     : (nrt,)         i32  #nonzero K-tiles per row tile
       max_cnt : python int          grid extent of the reduction axis
       n_pad   : python int
    """
    block = max(tm, tk)
    n_pad = _round_up(max(n_nodes, 1), block)
    src = np.asarray(edge_index[0]).astype(np.int64)
    dst = np.asarray(edge_index[1]).astype(np.int64)

    # A_count[i, j] = #edges j->i plus self loops (matches PyG gcn_norm scatter_add;
    # duplicate edges each contribute).
    adj = np.zeros((n_pad, n_pad), np.float32)
    np.add.at(adj, (dst, src), 1.0)
    idx = np.arange(n_nodes)
    adj[idx, idx] += 1.0
    assert adj.max() <= 256.0, "bf16 adjacency counts are only exact up to 256"

    deg = adj.sum(axis=1, keepdims=True)
    dis = np.where(deg > 0.0, 1.0 / np.sqrt(np.maximum(deg, 1e-12)), 0.0).astype(np.float32)

    b = np.asarray(batch).astype(np.int64)
    onehot = (b[None, :] == np.arange(n_graphs)[:, None]).astype(np.float32)
    counts_per_graph = np.maximum(onehot.sum(axis=1, keepdims=True), 1.0)
    P = np.zeros((n_graphs, n_pad), np.float32)
    P[:, :n_nodes] = onehot / counts_per_graph

    # Block-CSR over (tm, tk) adjacency tiles: skip all-zero tiles entirely.
    nrt, nkt = n_pad // tm, n_pad // tk
    blk_nz = adj.reshape(nrt, tm, nkt, tk).sum(axis=(1, 3)) > 0.0
    cnt = blk_nz.sum(axis=1).astype(np.int32)
    max_cnt = max(int(cnt.max()), 1)
    blk = np.zeros((nrt, max_cnt), np.int32)
    for i in range(nrt):
        nz = np.nonzero(blk_nz[i])[0].astype(np.int32)
        if nz.size == 0:
            nz = np.zeros((1,), np.int32)
        blk[i, :nz.size] = nz
        blk[i, nz.size:] = nz[-1]   # repeat last index -> no extra DMA, compute gated off

    return (jnp.asarray(adj, dtype=jnp.bfloat16),
            jnp.asarray(dis),
            jnp.asarray(P),
            jnp.asarray(blk.reshape(-1)),
            jnp.asarray(cnt),
            max_cnt,
            n_pad)


def _fold_conv_bn(params, k):
    """Fold conv bias + eval-mode BatchNorm into (W', shift')."""
    eps = 1e-5
    scale = params[f"bn{k}_w"] * jax.lax.rsqrt(params[f"bn{k}_var"] + eps)   # (F_out,)
    w_folded = params[f"w{k}"] * scale[None, :]
    shift = (params[f"b{k}"] * scale[None, :]
             + params[f"bn{k}_b"][None, :]
             - params[f"bn{k}_mean"][None, :] * scale[None, :])
    return w_folded, shift


# ----------------------------------------------------------------------------
# Pallas call wrappers
# ----------------------------------------------------------------------------
def _gcn_layer_call(h, A, dis, blk, cnt, w, shift, *,
                    tm, tk, max_cnt, scale_output, vmem_limit):
    n_pad = A.shape[0]
    f_in, f_out = w.shape
    nrt = n_pad // tm
    grid = (nrt, max_cnt)
    kernel = functools.partial(gcn_layer_kernel, scale_output=scale_output)

    def a_map(i, k, blk_s, cnt_s):
        return (i, blk_s[i * max_cnt + k])

    def h_map(i, k, blk_s, cnt_s):
        return (blk_s[i * max_cnt + k], 0)

    return pl.pallas_call(
        kernel,
        out_shape=jax.ShapeDtypeStruct((n_pad, f_out), jnp.float32),
        grid_spec=pltpu.PrefetchScalarGridSpec(
            num_scalar_prefetch=2,
            grid=grid,
            in_specs=[
                pl.BlockSpec((tm, tk), a_map),                              # A tile (bf16)
                pl.BlockSpec((tk, f_in), h_map),                            # pre-scaled h rows
                pl.BlockSpec((tm, 1), lambda i, k, blk_s, cnt_s: (i, 0)),   # deg^-1/2 rows
                pl.BlockSpec((f_in, f_out), lambda i, k, blk_s, cnt_s: (0, 0)),  # folded W
                pl.BlockSpec((1, f_out), lambda i, k, blk_s, cnt_s: (0, 0)),     # folded shift
            ],
            out_specs=pl.BlockSpec((tm, f_out), lambda i, k, blk_s, cnt_s: (i, 0)),
            scratch_shapes=[pltpu.VMEM((tm, f_in), jnp.float32)],
        ),
        compiler_params=pltpu.CompilerParams(
            dimension_semantics=("parallel", "arbitrary"),
            vmem_limit_bytes=vmem_limit,
        ),
    )(blk, cnt, A, h, dis, w, shift)


def _head_call(h, P, params, *, vmem_limit):
    n_graphs = P.shape[0]
    n_classes = params["wm2"].shape[1]
    vmem_spec = pl.BlockSpec(memory_space=pltpu.MemorySpace.VMEM)
    # TODO(synk): for very large N_pad, tile the P @ h pooling reduction as well;
    # at molecular-graph sizes the resident footprint is tiny.
    return pl.pallas_call(
        head_kernel,
        out_shape=jax.ShapeDtypeStruct((n_graphs, n_classes), jnp.float32),
        in_specs=[vmem_spec] * 6,
        out_specs=vmem_spec,
        compiler_params=pltpu.CompilerParams(vmem_limit_bytes=vmem_limit),
    )(P, h, params["wm1"], params["bm1"], params["wm2"], params["bm2"])


@functools.partial(jax.jit,
                   static_argnames=("tm", "tk", "max_cnt", "vmem_limit", "head_vmem_limit"))
def gcn3bn3mlp2_forward(x, A, dis, P, blk, cnt, params, *,
                        tm, tk, max_cnt, vmem_limit, head_vmem_limit):
    """Full forward pass. A/dis/P/blk/cnt come from build_graph_operators (cacheable)."""
    n_pad = A.shape[0]
    n_nodes, f_in = x.shape
    x_pad = jnp.zeros((n_pad, f_in), jnp.float32).at[:n_nodes].set(x)
    # Pre-scale the input by deg^-1/2 once; subsequent layers receive activations
    # already pre-scaled inside the previous kernel (scale_output=True).
    h = x_pad * dis
    # TODO(synk): optionally fuse the three GCN layers into one pallas_call keeping
    # the (N_pad, hidden) activations resident in VMEM scratch between layers.
    for layer in (1, 2, 3):
        w, shift = _fold_conv_bn(params, layer)
        h = _gcn_layer_call(h, A, dis, blk, cnt, w, shift,
                            tm=tm, tk=tk, max_cnt=max_cnt,
                            scale_output=(layer < 3), vmem_limit=vmem_limit)
    return _head_call(h, P, params, vmem_limit=head_vmem_limit)


# ----------------------------------------------------------------------------
# Parameter init (deterministic synthetic weights, PyG-style shapes)
# ----------------------------------------------------------------------------
def init_params(key, emb_dim, hidden_dim, n_classes):
    ks = jax.random.split(key, 24)

    def lin(k, fin, fout):
        return jax.random.normal(k, (fin, fout), jnp.float32) * (1.0 / jnp.sqrt(fin))

    dims = [emb_dim, hidden_dim, hidden_dim, hidden_dim]
    params = {}
    ki = 0
    for layer in (1, 2, 3):
        fin, fout = dims[layer - 1], dims[layer]
        params[f"w{layer}"] = lin(ks[ki], fin, fout); ki += 1
        params[f"b{layer}"] = 0.01 * jax.random.normal(ks[ki], (1, fout), jnp.float32); ki += 1
        params[f"bn{layer}_w"] = 1.0 + 0.1 * jax.random.normal(ks[ki], (fout,), jnp.float32); ki += 1
        params[f"bn{layer}_b"] = 0.1 * jax.random.normal(ks[ki], (fout,), jnp.float32); ki += 1
        params[f"bn{layer}_mean"] = 0.05 * jax.random.normal(ks[ki], (fout,), jnp.float32); ki += 1
        params[f"bn{layer}_var"] = 1.0 + 0.1 * jax.random.uniform(ks[ki], (fout,), jnp.float32); ki += 1
    params["wm1"] = lin(ks[ki], hidden_dim, hidden_dim); ki += 1
    params["bm1"] = 0.01 * jax.random.normal(ks[ki], (1, hidden_dim), jnp.float32); ki += 1
    params["wm2"] = lin(ks[ki], hidden_dim, n_classes); ki += 1
    params["bm2"] = 0.01 * jax.random.normal(ks[ki], (1, n_classes), jnp.float32); ki += 1
    return params


# ----------------------------------------------------------------------------
# Demo
# ----------------------------------------------------------------------------
if __name__ == "__main__":
    emb_dim, hidden_dim, n_classes = 16, 32, 2
    n_nodes, n_edges, n_graphs = 64, 160, 4

    key = jax.random.PRNGKey(0)
    k_x, k_e, k_p = jax.random.split(key, 3)

    x = jax.random.normal(k_x, (n_nodes, emb_dim), jnp.float32)
    edge_index = jax.random.randint(k_e, (2, n_edges), 0, n_nodes, dtype=jnp.int32)
    batch = jnp.repeat(jnp.arange(n_graphs, dtype=jnp.int32), n_nodes // n_graphs)
    params = init_params(k_p, emb_dim, hidden_dim, n_classes)

    # Chip-aware VMEM budget and tiles, then graph-static operators (cacheable).
    budget = _vmem_budget()
    tm, tk = choose_tiles(n_nodes, emb_dim, hidden_dim, budget)
    A, dis, P, blk, cnt, max_cnt, n_pad = build_graph_operators(
        edge_index, batch, n_nodes, n_graphs, tm, tk)

    layer_vmem = int(min(budget,
                         max(_layer_footprint(tm, tk, hidden_dim, hidden_dim) + (8 << 20),
                             32 << 20)))
    head_bytes = (_buf_bytes(n_graphs, n_pad, 4) + _buf_bytes(n_pad, hidden_dim, 4)
                  + 4 * _buf_bytes(hidden_dim, hidden_dim, 4))
    head_vmem = int(min(budget, max(2 * head_bytes + (8 << 20), 32 << 20)))

    out = gcn3bn3mlp2_forward(x, A, dis, P, blk, cnt, params,
                              tm=tm, tk=tk, max_cnt=max_cnt,
                              vmem_limit=layer_vmem, head_vmem_limit=head_vmem)
    out = jax.block_until_ready(out)

    assert out.shape == (n_graphs, n_classes)
    assert bool(jnp.all(jnp.isfinite(out)))
    # log_softmax rows should sum to ~1 in prob space.
    assert bool(jnp.allclose(jnp.sum(jnp.exp(out), axis=1), 1.0, atol=1e-4))
    print("KERNEL_OK")
</pallas_src>

<mosaic_0001>
module attributes {stable_mosaic.version = 11 : i64} {
  func.func @gcn_layer_kernel(%arg0: i32, %arg1: i32, %arg2: memref<1xi32, #tpu.memory_space<smem>>, %arg3: memref<1xi32, #tpu.memory_space<smem>>, %arg4: memref<128x128xbf16, #tpu.memory_space<vmem>>, %arg5: memref<128x16xf32, #tpu.memory_space<vmem>>, %arg6: memref<128x1xf32, #tpu.memory_space<vmem>>, %arg7: memref<16x32xf32, #tpu.memory_space<vmem>>, %arg8: memref<1x32xf32, #tpu.memory_space<vmem>>, %arg9: memref<128x32xf32, #tpu.memory_space<vmem>>, %arg10: memref<128x16xf32, #tpu.memory_space<vmem>>) attributes {dimension_semantics = [#tpu.dimension_semantics<parallel>, #tpu.dimension_semantics<arbitrary>], iteration_bounds = array<i64: 1, 1>, scalar_prefetch = 2 : i64, scratch_operands = 1 : i64, tpu.core_type = #tpu.core_type<tc>, window_params = [{transform_indices = @transform_0, window_bounds = array<i64: 128, 128>}, {transform_indices = @transform_1, window_bounds = array<i64: 128, 16>}, {transform_indices = @transform_2, window_bounds = array<i64: 128, 1>}, {pipeline_mode = #tpu.pipeline_mode<synchronous>, transform_indices = @transform_3, window_bounds = array<i64: 16, 32>}, {pipeline_mode = #tpu.pipeline_mode<synchronous>, transform_indices = @transform_4, window_bounds = array<i64: 1, 32>}, {transform_indices = @transform_5, window_bounds = array<i64: 128, 32>}]} {
    %c0_i32 = arith.constant 0 : i32
    %0 = arith.cmpi eq, %arg1, %c0_i32 : i32
    %1 = arith.extui %0 : i1 to i32
    %c0_i32_0 = arith.constant 0 : i32
    %2 = arith.cmpi ne, %1, %c0_i32_0 : i32
    scf.if %2 {
      %cst = arith.constant 0.000000e+00 : f32
      %11 = vector.broadcast %cst : f32 to vector<128x16xf32>
      %c0 = arith.constant 0 : index
      %c0_4 = arith.constant 0 : index
      %12 = vector.load %arg10[%c0, %c0_4] : memref<128x16xf32, #tpu.memory_space<vmem>>, vector<128x16xf32>
      tpu.vector_store %arg10[%c0, %c0_4], %11 {strides = array<i32>} : memref<128x16xf32, #tpu.memory_space<vmem>>, vector<128x16xf32>,
    } else {
    }
    %3 = arith.index_cast %arg0 : i32 to index
    %4 = memref.load %arg3[%3] : memref<1xi32, #tpu.memory_space<smem>>
    %5 = arith.cmpi slt, %arg1, %4 : i32
    %6 = arith.extui %5 : i1 to i32
    %c0_i32_1 = arith.constant 0 : i32
    %7 = arith.cmpi ne, %6, %c0_i32_1 : i32
    scf.if %7 {
      %c0 = arith.constant 0 : index
      %c0_4 = arith.constant 0 : index
      %11 = vector.load %arg10[%c0, %c0_4] : memref<128x16xf32, #tpu.memory_space<vmem>>, vector<128x16xf32>
      %c0_5 = arith.constant 0 : index
      %c0_6 = arith.constant 0 : index
      %12 = vector.load %arg4[%c0_5, %c0_6] : memref<128x128xbf16, #tpu.memory_space<vmem>>, vector<128x128xbf16>
      %c0_7 = arith.constant 0 : index
      %c0_8 = arith.constant 0 : index
      %13 = vector.load %arg5[%c0_7, %c0_8] : memref<128x16xf32, #tpu.memory_space<vmem>>, vector<128x16xf32>
      %14 = arith.truncf %13 : vector<128x16xf32> to vector<128x16xbf16>
      %cst = arith.constant dense<0.000000e+00> : vector<128x16xf32>
      %15 = tpu.matmul %12, %14, %cst {dimension_numbers = #tpu.dot_dimension_numbers<[1], [0], [0], [1], [0, 0, 1, 1], [], []>} : vector<128x128xbf16>, vector<128x16xbf16>, vector<128x16xf32> -> vector<128x16xf32>
      %16 = arith.addf %11, %15 : vector<128x16xf32>
      %c0_9 = arith.constant 0 : index
      %c0_10 = arith.constant 0 : index
      %17 = vector.load %arg10[%c0_9, %c0_10] : memref<128x16xf32, #tpu.memory_space<vmem>>, vector<128x16xf32>
      tpu.vector_store %arg10[%c0_9, %c0_10], %16 {strides = array<i32>} : memref<128x16xf32, #tpu.memory_space<vmem>>, vector<128x16xf32>,
    } else {
    }
    %c0_i32_2 = arith.constant 0 : i32
    %8 = arith.cmpi eq, %arg1, %c0_i32_2 : i32
    %9 = arith.extui %8 : i1 to i32
    %c0_i32_3 = arith.constant 0 : i32
    %10 = arith.cmpi ne, %9, %c0_i32_3 : i32
    scf.if %10 {
      %c0 = arith.constant 0 : index
      %c0_4 = arith.constant 0 : index
      %11 = vector.load %arg10[%c0, %c0_4] : memref<128x16xf32, #tpu.memory_space<vmem>>, vector<128x16xf32>
      %c0_5 = arith.constant 0 : index
      %c0_6 = arith.constant 0 : index
      %12 = vector.load %arg6[%c0_5, %c0_6] : memref<128x1xf32, #tpu.memory_space<vmem>>, vector<128x1xf32>
      %13 = vector.broadcast %12 : vector<128x1xf32> to vector<128x16xf32>
      %14 = arith.mulf %11, %13 : vector<128x16xf32>
      %c0_7 = arith.constant 0 : index
      %c0_8 = arith.constant 0 : index
      %15 = vector.load %arg7[%c0_7, %c0_8] : memref<16x32xf32, #tpu.memory_space<vmem>>, vector<16x32xf32>
      %cst = arith.constant dense<0.000000e+00> : vector<128x32xf32>
      %16 = tpu.matmul %14, %15, %cst {dimension_numbers = #tpu.dot_dimension_numbers<[1], [0], [0], [1], [0, 0, 1, 1], [], []>} : vector<128x16xf32>, vector<16x32xf32>, vector<128x32xf32> -> vector<128x32xf32>
      %c0_9 = arith.constant 0 : index
      %c0_10 = arith.constant 0 : index
      %17 = vector.load %arg8[%c0_9, %c0_10] : memref<1x32xf32, #tpu.memory_space<vmem>>, vector<1x32xf32>
      %18 = vector.broadcast %17 : vector<1x32xf32> to vector<128x32xf32>
      %19 = arith.addf %16, %18 : vector<128x32xf32>
      %cst_11 = arith.constant 0.000000e+00 : f32
      %20 = vector.broadcast %cst_11 : f32 to vector<128x32xf32>
      %21 = arith.maximumf %19, %20 : vector<128x32xf32>
      %c0_12 = arith.constant 0 : index
      %c0_13 = arith.constant 0 : index
      %22 = vector.load %arg6[%c0_12, %c0_13] : memref<128x1xf32, #tpu.memory_space<vmem>>, vector<128x1xf32>
      %23 = vector.broadcast %22 : vector<128x1xf32> to vector<128x32xf32>
      %24 = arith.mulf %21, %23 : vector<128x32xf32>
      %c0_14 = arith.constant 0 : index
      %c0_15 = arith.constant 0 : index
      %25 = vector.load %arg9[%c0_14, %c0_15] : memref<128x32xf32, #tpu.memory_space<vmem>>, vector<128x32xf32>
      tpu.vector_store %arg9[%c0_14, %c0_15], %24 {strides = array<i32>} : memref<128x32xf32, #tpu.memory_space<vmem>>, vector<128x32xf32>,
    } else {
    }
    return
  }
  func.func @transform_0(%arg0: i32, %arg1: i32, %arg2: memref<1xi32, #tpu.memory_space<smem>>, %arg3: memref<1xi32, #tpu.memory_space<smem>>) -> (i32, i32) {
    %c1_i32 = arith.constant 1 : i32
    %0 = arith.muli %arg0, %c1_i32 : i32
    %1 = arith.addi %0, %arg1 : i32
    %2 = arith.index_cast %1 : i32 to index
    %3 = memref.load %arg2[%2] : memref<1xi32, #tpu.memory_space<smem>>
    %c0_i32 = arith.constant 0 : i32
    return %arg0, %3 : i32, i32
  }
  func.func @transform_1(%arg0: i32, %arg1: i32, %arg2: memref<1xi32, #tpu.memory_space<smem>>, %arg3: memref<1xi32, #tpu.memory_space<smem>>) -> (i32, i32) {
    %c1_i32 = arith.constant 1 : i32
    %0 = arith.muli %arg0, %c1_i32 : i32
    %1 = arith.addi %0, %arg1 : i32
    %2 = arith.index_cast %1 : i32 to index
    %3 = memref.load %arg2[%2] : memref<1xi32, #tpu.memory_space<smem>>
    %c0_i32 = arith.constant 0 : i32
    %c0_i32_0 = arith.constant 0 : i32
    return %3, %c0_i32 : i32, i32
  }
  func.func @transform_2(%arg0: i32, %arg1: i32, %arg2: memref<1xi32, #tpu.memory_space<smem>>, %arg3: memref<1xi32, #tpu.memory_space<smem>>) -> (i32, i32) {
    %c0_i32 = arith.constant 0 : i32
    %c0_i32_0 = arith.constant 0 : i32
    return %arg0, %c0_i32 : i32, i32
  }
  func.func @transform_3(%arg0: i32, %arg1: i32, %arg2: memref<1xi32, #tpu.memory_space<smem>>, %arg3: memref<1xi32, #tpu.memory_space<smem>>) -> (i32, i32) {
    %c0_i32 = arith.constant 0 : i32
    %c0_i32_0 = arith.constant 0 : i32
    %c0_i32_1 = arith.constant 0 : i32
    return %c0_i32, %c0_i32_0 : i32, i32
  }
  func.func @transform_4(%arg0: i32, %arg1: i32, %arg2: memref<1xi32, #tpu.memory_space<smem>>, %arg3: memref<1xi32, #tpu.memory_space<smem>>) -> (i32, i32) {
    %c0_i32 = arith.constant 0 : i32
    %c0_i32_0 = arith.constant 0 : i32
    %c0_i32_1 = arith.constant 0 : i32
    return %c0_i32, %c0_i32_0 : i32, i32
  }
  func.func @transform_5(%arg0: i32, %arg1: i32, %arg2: memref<1xi32, #tpu.memory_space<smem>>, %arg3: memref<1xi32, #tpu.memory_space<smem>>) -> (i32, i32) {
    %c0_i32 = arith.constant 0 : i32
    %c0_i32_0 = arith.constant 0 : i32
    return %arg0, %c0_i32 : i32, i32
  }
}

module attributes {stable_mosaic.version = 11 : i64} {
  func.func @gcn_layer_kernel(%arg0: i32, %arg1: i32, %arg2: memref<1xi32, #tpu.memory_space<smem>>, %arg3: memref<1xi32, #tpu.memory_space<smem>>, %arg4: memref<128x128xbf16, #tpu.memory_space<vmem>>, %arg5: memref<128x32xf32, #tpu.memory_space<vmem>>, %arg6: memref<128x1xf32, #tpu.memory_space<vmem>>, %arg7: memref<32x32xf32, #tpu.memory_space<vmem>>, %arg8: memref<1x32xf32, #tpu.memory_space<vmem>>, %arg9: memref<128x32xf32, #tpu.memory_space<vmem>>, %arg10: memref<128x32xf32, #tpu.memory_space<vmem>>) attributes {dimension_semantics = [#tpu.dimension_semantics<parallel>, #tpu.dimension_semantics<arbitrary>], iteration_bounds = array<i64: 1, 1>, scalar_prefetch = 2 : i64, scratch_operands = 1 : i64, tpu.core_type = #tpu.core_type<tc>, window_params = [{transform_indices = @transform_0, window_bounds = array<i64: 128, 128>}, {transform_indices = @transform_1, window_bounds = array<i64: 128, 32>}, {transform_indices = @transform_2, window_bounds = array<i64: 128, 1>}, {pipeline_mode = #tpu.pipeline_mode<synchronous>, transform_indices = @transform_3, window_bounds = array<i64: 32, 32>}, {pipeline_mode = #tpu.pipeline_mode<synchronous>, transform_indices = @transform_4, window_bounds = array<i64: 1, 32>}, {transform_indices = @transform_5, window_bounds = array<i64: 128, 32>}]} {
    %c0_i32 = arith.constant 0 : i32
    %0 = arith.cmpi eq, %arg1, %c0_i32 : i32
    %1 = arith.extui %0 : i1 to i32
    %c0_i32_0 = arith.constant 0 : i32
    %2 = arith.cmpi ne, %1, %c0_i32_0 : i32
    scf.if %2 {
      %cst = arith.constant 0.000000e+00 : f32
      %11 = vector.broadcast %cst : f32 to vector<128x32xf32>
      %c0 = arith.constant 0 : index
      %c0_4 = arith.constant 0 : index
      %12 = vector.load %arg10[%c0, %c0_4] : memref<128x32xf32, #tpu.memory_space<vmem>>, vector<128x32xf32>
      tpu.vector_store %arg10[%c0, %c0_4], %11 {strides = array<i32>} : memref<128x32xf32, #tpu.memory_space<vmem>>, vector<128x32xf32>,
    } else {
    }
    %3 = arith.index_cast %arg0 : i32 to index
    %4 = memref.load %arg3[%3] : memref<1xi32, #tpu.memory_space<smem>>
    %5 = arith.cmpi slt, %arg1, %4 : i32
    %6 = arith.extui %5 : i1 to i32
    %c0_i32_1 = arith.constant 0 : i32
    %7 = arith.cmpi ne, %6, %c0_i32_1 : i32
    scf.if %7 {
      %c0 = arith.constant 0 : index
      %c0_4 = arith.constant 0 : index
      %11 = vector.load %arg10[%c0, %c0_4] : memref<128x32xf32, #tpu.memory_space<vmem>>, vector<128x32xf32>
      %c0_5 = arith.constant 0 : index
      %c0_6 = arith.constant 0 : index
      %12 = vector.load %arg4[%c0_5, %c0_6] : memref<128x128xbf16, #tpu.memory_space<vmem>>, vector<128x128xbf16>
      %c0_7 = arith.constant 0 : index
      %c0_8 = arith.constant 0 : index
      %13 = vector.load %arg5[%c0_7, %c0_8] : memref<128x32xf32, #tpu.memory_space<vmem>>, vector<128x32xf32>
      %14 = arith.truncf %13 : vector<128x32xf32> to vector<128x32xbf16>
      %cst = arith.constant dense<0.000000e+00> : vector<128x32xf32>
      %15 = tpu.matmul %12, %14, %cst {dimension_numbers = #tpu.dot_dimension_numbers<[1], [0], [0], [1], [0, 0, 1, 1], [], []>} : vector<128x128xbf16>, vector<128x32xbf16>, vector<128x32xf32> -> vector<128x32xf32>
      %16 = arith.addf %11, %15 : vector<128x32xf32>
      %c0_9 = arith.constant 0 : index
      %c0_10 = arith.constant 0 : index
      %17 = vector.load %arg10[%c0_9, %c0_10] : memref<128x32xf32, #tpu.memory_space<vmem>>, vector<128x32xf32>
      tpu.vector_store %arg10[%c0_9, %c0_10], %16 {strides = array<i32>} : memref<128x32xf32, #tpu.memory_space<vmem>>, vector<128x32xf32>,
    } else {
    }
    %c0_i32_2 = arith.constant 0 : i32
    %8 = arith.cmpi eq, %arg1, %c0_i32_2 : i32
    %9 = arith.extui %8 : i1 to i32
    %c0_i32_3 = arith.constant 0 : i32
    %10 = arith.cmpi ne, %9, %c0_i32_3 : i32
    scf.if %10 {
      %c0 = arith.constant 0 : index
      %c0_4 = arith.constant 0 : index
      %11 = vector.load %arg10[%c0, %c0_4] : memref<128x32xf32, #tpu.memory_space<vmem>>, vector<128x32xf32>
      %c0_5 = arith.constant 0 : index
      %c0_6 = arith.constant 0 : index
      %12 = vector.load %arg6[%c0_5, %c0_6] : memref<128x1xf32, #tpu.memory_space<vmem>>, vector<128x1xf32>
      %13 = vector.broadcast %12 : vector<128x1xf32> to vector<128x32xf32>
      %14 = arith.mulf %11, %13 : vector<128x32xf32>
      %c0_7 = arith.constant 0 : index
      %c0_8 = arith.constant 0 : index
      %15 = vector.load %arg7[%c0_7, %c0_8] : memref<32x32xf32, #tpu.memory_space<vmem>>, vector<32x32xf32>
      %cst = arith.constant dense<0.000000e+00> : vector<128x32xf32>
      %16 = tpu.matmul %14, %15, %cst {dimension_numbers = #tpu.dot_dimension_numbers<[1], [0], [0], [1], [0, 0, 1, 1], [], []>} : vector<128x32xf32>, vector<32x32xf32>, vector<128x32xf32> -> vector<128x32xf32>
      %c0_9 = arith.constant 0 : index
      %c0_10 = arith.constant 0 : index
      %17 = vector.load %arg8[%c0_9, %c0_10] : memref<1x32xf32, #tpu.memory_space<vmem>>, vector<1x32xf32>
      %18 = vector.broadcast %17 : vector<1x32xf32> to vector<128x32xf32>
      %19 = arith.addf %16, %18 : vector<128x32xf32>
      %cst_11 = arith.constant 0.000000e+00 : f32
      %20 = vector.broadcast %cst_11 : f32 to vector<128x32xf32>
      %21 = arith.maximumf %19, %20 : vector<128x32xf32>
      %c0_12 = arith.constant 0 : index
      %c0_13 = arith.constant 0 : index
      %22 = vector.load %arg6[%c0_12, %c0_13] : memref<128x1xf32, #tpu.memory_space<vmem>>, vector<128x1xf32>
      %23 = vector.broadcast %22 : vector<128x1xf32> to vector<128x32xf32>
      %24 = arith.mulf %21, %23 : vector<128x32xf32>
      %c0_14 = arith.constant 0 : index
      %c0_15 = arith.constant 0 : index
      %25 = vector.load %arg9[%c0_14, %c0_15] : memref<128x32xf32, #tpu.memory_space<vmem>>, vector<128x32xf32>
      tpu.vector_store %arg9[%c0_14, %c0_15], %24 {strides = array<i32>} : memref<128x32xf32, #tpu.memory_space<vmem>>, vector<128x32xf32>,
    } else {
    }
    return
  }
  func.func @transform_0(%arg0: i32, %arg1: i32, %arg2: memref<1xi32, #tpu.memory_space<smem>>, %arg3: memref<1xi32, #tpu.memory_space<smem>>) -> (i32, i32) {
    %c1_i32 = arith.constant 1 : i32
    %0 = arith.muli %arg0, %c1_i32 : i32
    %1 = arith.addi %0, %arg1 : i32
    %2 = arith.index_cast %1 : i32 to index
    %3 = memref.load %arg2[%2] : memref<1xi32, #tpu.memory_space<smem>>
    %c0_i32 = arith.constant 0 : i32
    return %arg0, %3 : i32, i32
  }
  func.func @transform_1(%arg0: i32, %arg1: i32, %arg2: memref<1xi32, #tpu.memory_space<smem>>, %arg3: memref<1xi32, #tpu.memory_space<smem>>) -> (i32, i32) {
    %c1_i32 = arith.constant 1 : i32
    %0 = arith.muli %arg0, %c1_i32 : i32
    %1 = arith.addi %0, %arg1 : i32
    %2 = arith.index_cast %1 : i32 to index
    %3 = memref.load %arg2[%2] : memref<1xi32, #tpu.memory_space<smem>>
    %c0_i32 = arith.constant 0 : i32
    %c0_i32_0 = arith.constant 0 : i32
    return %3, %c0_i32 : i32, i32
  }
  func.func @transform_2(%arg0: i32, %arg1: i32, %arg2: memref<1xi32, #tpu.memory_space<smem>>, %arg3: memref<1xi32, #tpu.memory_space<smem>>) -> (i32, i32) {
    %c0_i32 = arith.constant 0 : i32
    %c0_i32_0 = arith.constant 0 : i32
    return %arg0, %c0_i32 : i32, i32
  }
  func.func @transform_3(%arg0: i32, %arg1: i32, %arg2: memref<1xi32, #tpu.memory_space<smem>>, %arg3: memref<1xi32, #tpu.memory_space<smem>>) -> (i32, i32) {
    %c0_i32 = arith.constant 0 : i32
    %c0_i32_0 = arith.constant 0 : i32
    %c0_i32_1 = arith.constant 0 : i32
    return %c0_i32, %c0_i32_0 : i32, i32
  }
  func.func @transform_4(%arg0: i32, %arg1: i32, %arg2: memref<1xi32, #tpu.memory_space<smem>>, %arg3: memref<1xi32, #tpu.memory_space<smem>>) -> (i32, i32) {
    %c0_i32 = arith.constant 0 : i32
    %c0_i32_0 = arith.constant 0 : i32
    %c0_i32_1 = arith.constant 0 : i32
    return %c0_i32, %c0_i32_0 : i32, i32
  }
  func.func @transform_5(%arg0: i32, %arg1: i32, %arg2: memref<1xi32, #tpu.memory_space<smem>>, %arg3: memref<1xi32, #tpu.memory_space<smem>>) -> (i32, i32) {
    %c0_i32 = arith.constant 0 : i32
    %c0_i32_0 = arith.constant 0 : i32
    return %arg0, %c0_i32 : i32, i32
  }
}

module attributes {stable_mosaic.version = 11 : i64} {
  func.func @gcn_layer_kernel(%arg0: i32, %arg1: i32, %arg2: memref<1xi32, #tpu.memory_space<smem>>, %arg3: memref<1xi32, #tpu.memory_space<smem>>, %arg4: memref<128x128xbf16, #tpu.memory_space<vmem>>, %arg5: memref<128x32xf32, #tpu.memory_space<vmem>>, %arg6: memref<128x1xf32, #tpu.memory_space<vmem>>, %arg7: memref<32x32xf32, #tpu.memory_space<vmem>>, %arg8: memref<1x32xf32, #tpu.memory_space<vmem>>, %arg9: memref<128x32xf32, #tpu.memory_space<vmem>>, %arg10: memref<128x32xf32, #tpu.memory_space<vmem>>) attributes {dimension_semantics = [#tpu.dimension_semantics<parallel>, #tpu.dimension_semantics<arbitrary>], iteration_bounds = array<i64: 1, 1>, scalar_prefetch = 2 : i64, scratch_operands = 1 : i64, tpu.core_type = #tpu.core_type<tc>, window_params = [{transform_indices = @transform_0, window_bounds = array<i64: 128, 128>}, {transform_indices = @transform_1, window_bounds = array<i64: 128, 32>}, {transform_indices = @transform_2, window_bounds = array<i64: 128, 1>}, {pipeline_mode = #tpu.pipeline_mode<synchronous>, transform_indices = @transform_3, window_bounds = array<i64: 32, 32>}, {pipeline_mode = #tpu.pipeline_mode<synchronous>, transform_indices = @transform_4, window_bounds = array<i64: 1, 32>}, {transform_indices = @transform_5, window_bounds = array<i64: 128, 32>}]} {
    %c0_i32 = arith.constant 0 : i32
    %0 = arith.cmpi eq, %arg1, %c0_i32 : i32
    %1 = arith.extui %0 : i1 to i32
    %c0_i32_0 = arith.constant 0 : i32
    %2 = arith.cmpi ne, %1, %c0_i32_0 : i32
    scf.if %2 {
      %cst = arith.constant 0.000000e+00 : f32
      %11 = vector.broadcast %cst : f32 to vector<128x32xf32>
      %c0 = arith.constant 0 : index
      %c0_4 = arith.constant 0 : index
      %12 = vector.load %arg10[%c0, %c0_4] : memref<128x32xf32, #tpu.memory_space<vmem>>, vector<128x32xf32>
      tpu.vector_store %arg10[%c0, %c0_4], %11 {strides = array<i32>} : memref<128x32xf32, #tpu.memory_space<vmem>>, vector<128x32xf32>,
    } else {
    }
    %3 = arith.index_cast %arg0 : i32 to index
    %4 = memref.load %arg3[%3] : memref<1xi32, #tpu.memory_space<smem>>
    %5 = arith.cmpi slt, %arg1, %4 : i32
    %6 = arith.extui %5 : i1 to i32
    %c0_i32_1 = arith.constant 0 : i32
    %7 = arith.cmpi ne, %6, %c0_i32_1 : i32
    scf.if %7 {
      %c0 = arith.constant 0 : index
      %c0_4 = arith.constant 0 : index
      %11 = vector.load %arg10[%c0, %c0_4] : memref<128x32xf32, #tpu.memory_space<vmem>>, vector<128x32xf32>
      %c0_5 = arith.constant 0 : index
      %c0_6 = arith.constant 0 : index
      %12 = vector.load %arg4[%c0_5, %c0_6] : memref<128x128xbf16, #tpu.memory_space<vmem>>, vector<128x128xbf16>
      %c0_7 = arith.constant 0 : index
      %c0_8 = arith.constant 0 : index
      %13 = vector.load %arg5[%c0_7, %c0_8] : memref<128x32xf32, #tpu.memory_space<vmem>>, vector<128x32xf32>
      %14 = arith.truncf %13 : vector<128x32xf32> to vector<128x32xbf16>
      %cst = arith.constant dense<0.000000e+00> : vector<128x32xf32>
      %15 = tpu.matmul %12, %14, %cst {dimension_numbers = #tpu.dot_dimension_numbers<[1], [0], [0], [1], [0, 0, 1, 1], [], []>} : vector<128x128xbf16>, vector<128x32xbf16>, vector<128x32xf32> -> vector<128x32xf32>
      %16 = arith.addf %11, %15 : vector<128x32xf32>
      %c0_9 = arith.constant 0 : index
      %c0_10 = arith.constant 0 : index
      %17 = vector.load %arg10[%c0_9, %c0_10] : memref<128x32xf32, #tpu.memory_space<vmem>>, vector<128x32xf32>
      tpu.vector_store %arg10[%c0_9, %c0_10], %16 {strides = array<i32>} : memref<128x32xf32, #tpu.memory_space<vmem>>, vector<128x32xf32>,
    } else {
    }
    %c0_i32_2 = arith.constant 0 : i32
    %8 = arith.cmpi eq, %arg1, %c0_i32_2 : i32
    %9 = arith.extui %8 : i1 to i32
    %c0_i32_3 = arith.constant 0 : i32
    %10 = arith.cmpi ne, %9, %c0_i32_3 : i32
    scf.if %10 {
      %c0 = arith.constant 0 : index
      %c0_4 = arith.constant 0 : index
      %11 = vector.load %arg10[%c0, %c0_4] : memref<128x32xf32, #tpu.memory_space<vmem>>, vector<128x32xf32>
      %c0_5 = arith.constant 0 : index
      %c0_6 = arith.constant 0 : index
      %12 = vector.load %arg6[%c0_5, %c0_6] : memref<128x1xf32, #tpu.memory_space<vmem>>, vector<128x1xf32>
      %13 = vector.broadcast %12 : vector<128x1xf32> to vector<128x32xf32>
      %14 = arith.mulf %11, %13 : vector<128x32xf32>
      %c0_7 = arith.constant 0 : index
      %c0_8 = arith.constant 0 : index
      %15 = vector.load %arg7[%c0_7, %c0_8] : memref<32x32xf32, #tpu.memory_space<vmem>>, vector<32x32xf32>
      %cst = arith.constant dense<0.000000e+00> : vector<128x32xf32>
      %16 = tpu.matmul %14, %15, %cst {dimension_numbers = #tpu.dot_dimension_numbers<[1], [0], [0], [1], [0, 0, 1, 1], [], []>} : vector<128x32xf32>, vector<32x32xf32>, vector<128x32xf32> -> vector<128x32xf32>
      %c0_9 = arith.constant 0 : index
      %c0_10 = arith.constant 0 : index
      %17 = vector.load %arg8[%c0_9, %c0_10] : memref<1x32xf32, #tpu.memory_space<vmem>>, vector<1x32xf32>
      %18 = vector.broadcast %17 : vector<1x32xf32> to vector<128x32xf32>
      %19 = arith.addf %16, %18 : vector<128x32xf32>
      %cst_11 = arith.constant 0.000000e+00 : f32
      %20 = vector.broadcast %cst_11 : f32 to vector<128x32xf32>
      %21 = arith.maximumf %19, %20 : vector<128x32xf32>
      %c0_12 = arith.constant 0 : index
      %c0_13 = arith.constant 0 : index
      %22 = vector.load %arg9[%c0_12, %c0_13] : memref<128x32xf32, #tpu.memory_space<vmem>>, vector<128x32xf32>
      tpu.vector_store %arg9[%c0_12, %c0_13], %21 {strides = array<i32>} : memref<128x32xf32, #tpu.memory_space<vmem>>, vector<128x32xf32>,
    } else {
    }
    return
  }
  func.func @transform_0(%arg0: i32, %arg1: i32, %arg2: memref<1xi32, #tpu.memory_space<smem>>, %arg3: memref<1xi32, #tpu.memory_space<smem>>) -> (i32, i32) {
    %c1_i32 = arith.constant 1 : i32
    %0 = arith.muli %arg0, %c1_i32 : i32
    %1 = arith.addi %0, %arg1 : i32
    %2 = arith.index_cast %1 : i32 to index
    %3 = memref.load %arg2[%2] : memref<1xi32, #tpu.memory_space<smem>>
    %c0_i32 = arith.constant 0 : i32
    return %arg0, %3 : i32, i32
  }
  func.func @transform_1(%arg0: i32, %arg1: i32, %arg2: memref<1xi32, #tpu.memory_space<smem>>, %arg3: memref<1xi32, #tpu.memory_space<smem>>) -> (i32, i32) {
    %c1_i32 = arith.constant 1 : i32
    %0 = arith.muli %arg0, %c1_i32 : i32
    %1 = arith.addi %0, %arg1 : i32
    %2 = arith.index_cast %1 : i32 to index
    %3 = memref.load %arg2[%2] : memref<1xi32, #tpu.memory_space<smem>>
    %c0_i32 = arith.constant 0 : i32
    %c0_i32_0 = arith.constant 0 : i32
    return %3, %c0_i32 : i32, i32
  }
  func.func @transform_2(%arg0: i32, %arg1: i32, %arg2: memref<1xi32, #tpu.memory_space<smem>>, %arg3: memref<1xi32, #tpu.memory_space<smem>>) -> (i32, i32) {
    %c0_i32 = arith.constant 0 : i32
    %c0_i32_0 = arith.constant 0 : i32
    return %arg0, %c0_i32 : i32, i32
  }
  func.func @transform_3(%arg0: i32, %arg1: i32, %arg2: memref<1xi32, #tpu.memory_space<smem>>, %arg3: memref<1xi32, #tpu.memory_space<smem>>) -> (i32, i32) {
    %c0_i32 = arith.constant 0 : i32
    %c0_i32_0 = arith.constant 0 : i32
    %c0_i32_1 = arith.constant 0 : i32
    return %c0_i32, %c0_i32_0 : i32, i32
  }
  func.func @transform_4(%arg0: i32, %arg1: i32, %arg2: memref<1xi32, #tpu.memory_space<smem>>, %arg3: memref<1xi32, #tpu.memory_space<smem>>) -> (i32, i32) {
    %c0_i32 = arith.constant 0 : i32
    %c0_i32_0 = arith.constant 0 : i32
    %c0_i32_1 = arith.constant 0 : i32
    return %c0_i32, %c0_i32_0 : i32, i32
  }
  func.func @transform_5(%arg0: i32, %arg1: i32, %arg2: memref<1xi32, #tpu.memory_space<smem>>, %arg3: memref<1xi32, #tpu.memory_space<smem>>) -> (i32, i32) {
    %c0_i32 = arith.constant 0 : i32
    %c0_i32_0 = arith.constant 0 : i32
    return %arg0, %c0_i32 : i32, i32
  }
}

module attributes {stable_mosaic.version = 11 : i64} {
  func.func @head_kernel(%arg0: memref<4x128xf32, #tpu.memory_space<vmem>>, %arg1: memref<128x32xf32, #tpu.memory_space<vmem>>, %arg2: memref<32x32xf32, #tpu.memory_space<vmem>>, %arg3: memref<1x32xf32, #tpu.memory_space<vmem>>, %arg4: memref<32x2xf32, #tpu.memory_space<vmem>>, %arg5: memref<1x2xf32, #tpu.memory_space<vmem>>, %arg6: memref<4x2xf32, #tpu.memory_space<vmem>>) attributes {dimension_semantics = [], scalar_prefetch = 0 : i64, scratch_operands = 0 : i64, tpu.core_type = #tpu.core_type<tc>} {
    %c0 = arith.constant 0 : index
    %c0_0 = arith.constant 0 : index
    %0 = vector.load %arg0[%c0, %c0_0] : memref<4x128xf32, #tpu.memory_space<vmem>>, vector<4x128xf32>
    %c0_1 = arith.constant 0 : index
    %c0_2 = arith.constant 0 : index
    %1 = vector.load %arg1[%c0_1, %c0_2] : memref<128x32xf32, #tpu.memory_space<vmem>>, vector<128x32xf32>
    %cst = arith.constant dense<0.000000e+00> : vector<4x32xf32>
    %2 = tpu.matmul %0, %1, %cst {dimension_numbers = #tpu.dot_dimension_numbers<[1], [0], [0], [1], [0, 0, 1, 1], [], []>} : vector<4x128xf32>, vector<128x32xf32>, vector<4x32xf32> -> vector<4x32xf32>
    %c0_3 = arith.constant 0 : index
    %c0_4 = arith.constant 0 : index
    %3 = vector.load %arg2[%c0_3, %c0_4] : memref<32x32xf32, #tpu.memory_space<vmem>>, vector<32x32xf32>
    %cst_5 = arith.constant dense<0.000000e+00> : vector<4x32xf32>
    %4 = tpu.matmul %2, %3, %cst_5 {dimension_numbers = #tpu.dot_dimension_numbers<[1], [0], [0], [1], [0, 0, 1, 1], [], []>} : vector<4x32xf32>, vector<32x32xf32>, vector<4x32xf32> -> vector<4x32xf32>
    %c0_6 = arith.constant 0 : index
    %c0_7 = arith.constant 0 : index
    %5 = vector.load %arg3[%c0_6, %c0_7] : memref<1x32xf32, #tpu.memory_space<vmem>>, vector<1x32xf32>
    %6 = vector.broadcast %5 : vector<1x32xf32> to vector<4x32xf32>
    %7 = arith.addf %4, %6 : vector<4x32xf32>
    %c0_8 = arith.constant 0 : index
    %c0_9 = arith.constant 0 : index
    %8 = vector.load %arg4[%c0_8, %c0_9] : memref<32x2xf32, #tpu.memory_space<vmem>>, vector<32x2xf32>
    %cst_10 = arith.constant dense<0.000000e+00> : vector<4x2xf32>
    %9 = tpu.matmul %7, %8, %cst_10 {dimension_numbers = #tpu.dot_dimension_numbers<[1], [0], [0], [1], [0, 0, 1, 1], [], []>} : vector<4x32xf32>, vector<32x2xf32>, vector<4x2xf32> -> vector<4x2xf32>
    %c0_11 = arith.constant 0 : index
    %c0_12 = arith.constant 0 : index
    %10 = vector.load %arg5[%c0_11, %c0_12] : memref<1x2xf32, #tpu.memory_space<vmem>>, vector<1x2xf32>
    %11 = vector.broadcast %10 : vector<1x2xf32> to vector<4x2xf32>
    %12 = arith.addf %9, %11 : vector<4x2xf32>
    %cst_13 = arith.constant dense<0xFF800000> : vector<4xf32>
    %13 = vector.multi_reduction <maximumf>, %12, %cst_13 [1] : vector<4x2xf32> to vector<4xf32>
    %14 = vector.shape_cast %13 : vector<4xf32> to vector<4x1xf32>
    %15 = vector.broadcast %14 : vector<4x1xf32> to vector<4x2xf32>
    %16 = arith.subf %12, %15 : vector<4x2xf32>
    %17 = math.exp %16 : vector<4x2xf32>
    %cst_14 = arith.constant dense<0.000000e+00> : vector<4xf32>
    %18 = vector.multi_reduction <add>, %17, %cst_14 [1] : vector<4x2xf32> to vector<4xf32>
    %19 = vector.shape_cast %18 : vector<4xf32> to vector<4x1xf32>
    %20 = math.log %19 : vector<4x1xf32>
    %21 = arith.addf %20, %14 : vector<4x1xf32>
    %22 = vector.broadcast %21 : vector<4x1xf32> to vector<4x2xf32>
    %23 = arith.subf %12, %22 : vector<4x2xf32>
    %c0_15 = arith.constant 0 : index
    %c0_16 = arith.constant 0 : index
    %24 = vector.load %arg6[%c0_15, %c0_16] : memref<4x2xf32, #tpu.memory_space<vmem>>, vector<4x2xf32>
    tpu.vector_store %arg6[%c0_15, %c0_16], %23 {strides = array<i32>} : memref<4x2xf32, #tpu.memory_space<vmem>>, vector<4x2xf32>,
    return
  }
}

</mosaic_0001>

<bundles_post_ra>
// kernel: gcn3bn3mlp2_forward.7
= control target key start
LH: loop header
LB: loop body
LE: loop exit
PB: predicated region body
PF: predicated region fallthrough
CT: control target
= control target key end

     0   :  { %v429_v0 = vmov 0.0|0.0   ;;  %vm430_vm0 = vmmov 0   ;;  %v431_v4 = vmov 0.0   ;;  %vm121_vm1 = vcmask 261120   ;;  %s574_s1 = inlined_call_operand.vmem [shape: f32[128,32], index: 1, kind: input, shape index: {}]   ;;  %s575_s2 = inlined_call_operand.vmem [shape: f32[32,32], index: 2, kind: input, shape index: {}]   ;;  %s576_s0 = inlined_call_operand.vmem [shape: f32[4,128], index: 0, kind: input, shape index: {}]   ;;  %s577_s4 = inlined_call_operand.vmem [shape: f32[32,2], index: 4, kind: input, shape index: {}]   ;;  %s578_s3 = inlined_call_operand.vmem [shape: f32[1,32], index: 3, kind: input, shape index: {}]   ;;  %s579_s5 = inlined_call_operand.vmem [shape: f32[1,2], index: 5, kind: input, shape index: {}]   ;;  %s580_s6 = inlined_call_operand.vmem [shape: f32[4,2], index: 6, kind: output, shape index: {}]  }
   0x1   :  { %386 = vmatprep.subr.bf16.mxu0 %v429_v0  ;;  %v24_v1 = vld [vmem:[%s574_s1] sm:$0xff]  ;;  %v25_v2 = vld [vmem:[%s574_s1 + $0x8] sm:$0xff]  ;;  %v26_v3 = vld [vmem:[%s574_s1 + $0x10] sm:$0xff]  ;;  %361 = vmatprep.mubr.msk.f32.mxu0 %vm430_vm0, %v431_v4  ;;  %vm279_vm2 = vcmask 11264  }
   0x2   :  { %v387_v5 = vpack.c.bf16 %v25_v2, %v24_v1  ;;  %v27_v6 = vld [vmem:[%s574_s1 + $0x18] sm:$0xff]  ;;  %410 = vmatprep.subr.bf16.mxu1 %v429_v0  ;;  %372 = vmatprep.mubr.msk.f32.mxu1 %vm430_vm0, %v431_v4  ;;  %v28_v8 = vld [vmem:[%s574_s1 + $0x20] sm:$0xff]  ;;  %v29_v9 = vld [vmem:[%s574_s1 + $0x28] sm:$0xff] }
   0x3   :  { %v390_v7 = vpack.c.bf16 %v27_v6, %v26_v3  ;;  %v110_v10 = vld [vmem:[%s575_s2] sm:$0xff]  ;;  %v111_v11 = vld [vmem:[%s575_s2 + $0x8] sm:$0xff]  ;;  %v112_v12 = vld [vmem:[%s575_s2 + $0x10] sm:$0xff]  ;;  %v393_v14 = vpack.c.bf16 %v29_v9, %v28_v8 }
   0x4   :  { %388 = vmatpush3.bf16.msra.mxu0 %v387_v5  ;;  %v113_v13 = vld [vmem:[%s575_s2 + $0x18] sm:$0xff]  ;;  %v411_v15 = vpack.c.bf16 %v111_v11, %v110_v10  ;;  %v30_v16 = vld [vmem:[%s574_s1 + $0x30] sm:$0xff]  ;;  %v32_v20 = vld [vmem:[%s574_s1 + $0x40] sm:$0xff] }
   0x5   :  { %389 = vmatprep.subr.bf16.mxu0 %v429_v0  ;;  %v31_v17 = vld [vmem:[%s574_s1 + $0x38] sm:$0xff]  ;;  %v414_v18 = vpack.c.bf16 %v113_v13, %v112_v12  ;;  %v33_v21 = vld [vmem:[%s574_s1 + $0x48] sm:$0xff]  ;;  %v34_v23 = vld [vmem:[%s574_s1 + $0x50] sm:$0xff] }
   0x6   :  { %412 = vmatpush3.bf16.msra.mxu1 %v411_v15  ;;  %v396_v19 = vpack.c.bf16 %v31_v17, %v30_v16  ;;  %v399_v22 = vpack.c.bf16 %v33_v21, %v32_v20  ;;  %v35_v24 = vld [vmem:[%s574_s1 + $0x58] sm:$0xff]  ;;  %v36_v26 = vld [vmem:[%s574_s1 + $0x60] sm:$0xff]  ;;  %v37_v27 = vld [vmem:[%s574_s1 + $0x68] sm:$0xff] }
   0x7   :  { %413 = vmatprep.subr.bf16.mxu1 %v429_v0  ;;  %v402_v25 = vpack.c.bf16 %v35_v24, %v34_v23  ;;  %v405_v28 = vpack.c.bf16 %v37_v27, %v36_v26  ;;  %v38_v29 = vld [vmem:[%s574_s1 + $0x70] sm:$0xff]  ;;  %v39_v30 = vld [vmem:[%s574_s1 + $0x78] sm:$0xff]  ;;  %v23_v32 = vld [vmem:[%s576_s0] sm:$0xf] }
   0x8   :  { %391 = vmatpush3.bf16.msra.mxu0 %v390_v7  ;;  %v408_v31 = vpack.c.bf16 %v39_v30, %v38_v29  ;;  %v195_v33 = vld [vmem:[%s577_s4] sm:$0xff]  ;;  %v196_v34 = vld [vmem:[%s577_s4 + $0x8] sm:$0xff]  ;;  %v197_v38 = vld [vmem:[%s577_s4 + $0x10] sm:$0xff] }
   0x9   :  { %392 = vmatprep.subr.bf16.mxu0 %v429_v0  ;;  %v417_v35 = vpack.c.bf16 %v196_v34, %v195_v33  ;;  %v198_v39 = vld [vmem:[%s577_s4 + $0x18] sm:$0xff]  ;;  %v298_v41 = vld [vmem:[%s578_s3] ss:$0 sm:$0xff] }
   0xa   :  { %415 = vmatpush3.bf16.msra.mxu1 %v414_v18  ;;  %v420_v40 = vpack.c.bf16 %v198_v39, %v197_v38  ;;  %v300_v45 = vld [vmem:[%s579_s5] ss:$0 sm:$0xff] }
   0xb   :  { %416 = vmatprep.subr.bf16.mxu1 %v429_v0 }
   0xc   :  { %394 = vmatpush3.bf16.msra.mxu0 %v393_v14 }
   0xd   :  { %395 = vmatprep.subr.bf16.mxu0 %v429_v0 }
  0x10   :  { %397 = vmatpush3.bf16.msra.mxu0 %v396_v19 }
  0x11   :  { %398 = vmatprep.subr.bf16.mxu0 %v429_v0 }
  0x14   :  { %400 = vmatpush3.bf16.msra.mxu0 %v399_v22 }
  0x15   :  { %401 = vmatprep.subr.bf16.mxu0 %v429_v0 }
  0x18   :  { %403 = vmatpush3.bf16.msra.mxu0 %v402_v25 }
  0x19   :  { %404 = vmatprep.subr.bf16.mxu0 %v429_v0 }
  0x1c   :  { %406 = vmatpush3.bf16.msra.mxu0 %v405_v28 }
  0x1d   :  { %407 = vmatprep.subr.bf16.mxu0 %v429_v0 }
  0x20   :  { %409 = vmatpush3.bf16.msra.mxu0 %v408_v31 }
  0x23   :  { %362 = vmatmul.mubr.f32.vlgmr.msra.gmra.mrb[0].mxu0 %v23_v32 }
  0xf6   :  { %v106_v36 = vpop.f32.mrb[0].mxu0 }
  0xf7   :  { %v363_v37 = vpop.f32.mrb[1].mxu0  ;;  %373 = vmatmul.mubr.msk.f32.vlgmr.msra.gmra.mrb[0].mxu1 %vm121_vm1, %v106_v36 }
  0xf8   :  { %418 = vmatpush3.bf16.msra.mxu1 %v417_v35  ;;  %383 = vmatprep.mubr.msk.f32.mxu1 %vm430_vm0, %v431_v4 }
  0xf9   :  { %419 = vmatprep.subr.bf16.mxu1 %v429_v0 }
  0xfc   :  { %421 = vmatpush3.bf16.msra.mxu1 %v420_v40 }
 0x1ca   :  { %v191_v42 = vpop.f32.mrb[0].mxu1 }
 0x1cb   :  { %v192_v43 = vadd.f32 %v298_v41, %v191_v42  ;;  %v374_v44 = vpop.f32.mrb[1].mxu1 }
 0x1cd   :  { %384 = vmatmul.mubr.msk.f32.vlgmr.msra.gmra.mrb[2].mxu1 %vm121_vm1, %v192_v43 }
 0x2a0   :  { %v275_v46 = vpop.f32.mrb[2].mxu1 }
 0x2a1   :  { %v276_v47 = vadd.f32 %v300_v45, %v275_v46  ;;  %v385_v48 = vpop.f32.mrb[3].mxu1 }
 0x2a3   :  { %v280_v49 = vsel %vm279_vm2, %v276_v47, -inf }
 0x2a4   :  { %281 = vmax.xlane.f32.xlu0 %v280_v49 }
 0x331   :  { %v282_v50 = vpop.xlane.xlu0 %281 }
 0x332   :  { %v283_v51 = vsub.f32 %v276_v47, %v282_v50 }
 0x334   :  { %v284_v52 = vmul.f32 1.442695, %v283_v51 }
 0x336   :  { %425 = vpow2.f32 %v284_v52 }
 0x340   :  { %v426_v53 = vpop.eup %425 }
 0x341   :  { %v286_v54 = vsel %vm279_vm2, %v426_v53, 0.0 }
 0x342   :  { %287 = vadd.xlane.f32.xlu0 %v286_v54 }
 0x3cf   :  { %v288_v55 = vpop.xlane.xlu0 %287 }
 0x3d0   :  { %427 = vlog2.f32 %v288_v55 }
 0x3da   :  { %v428_v56 = vpop.eup %427 }
 0x3db   :  { %v290_v57 = vmul.f32 0.6931472, %v428_v56 }
 0x3dd   :  { %v291_v58 = vadd.f32 %v290_v57, %v282_v50 }
 0x3df   :  { %v292_v59 = vsub.f32 %v276_v47, %v291_v58 }
 0x3e1   :  { %293 = vst.msk [vmem:[%s580_s6] sm:$0xf] %vm279_vm2, %v292_v59 }

// kernel: gcn3bn3mlp2_forward.5
= control target key start
LH: loop header
LB: loop body
LE: loop exit
PB: predicated region body
PF: predicated region fallthrough
CT: control target
= control target key end

     0   :  { %vm78_vm0 = vcmask 261120   ;;  %v904_v0 = vmov 0.0   ;;  %s1253_s0 = inlined_call_operand.<no memory space> [shape: s32[1], index: 0, kind: input, shape index: {}]   ;;  %s1254_s1 = inlined_call_operand.<no memory space> [shape: s32[1], index: 1, kind: input, shape index: {}]   ;;  %s1255_s4 = inlined_call_operand.vmem [shape: f32[128,1], index: 4, kind: input, shape index: {}]   ;;  %s1256_s5 = inlined_call_operand.vmem [shape: f32[32,32], index: 5, kind: input, shape index: {}]   ;;  %s1257_s6 = inlined_call_operand.vmem [shape: f32[1,32], index: 6, kind: input, shape index: {}]   ;;  %s1258_s7 = inlined_call_operand.vmem [shape: f32[128,32], index: 7, kind: output, shape index: {}]   ;;  %s1259_s2 = inlined_call_operand.vmem [shape: bf16[128,128], index: 2, kind: input, shape index: {}]   ;;  %s1260_s3 = inlined_call_operand.vmem [shape: f32[128,32], index: 3, kind: input, shape index: {}]  }
   0x1   :  { %p57_p0 = scmp.lt.s32.totalorder %s1253_s0, 0  ;;  %s735_s28 = sshll.u32 %s1253_s0, 4  ;;  %79 = vst.msk [vmem:[#allocation2] sm:$0xff] %vm78_vm0, %v904_v0  ;;  %80 = vst.msk [vmem:[#allocation2 + $0x8] sm:$0xff] %vm78_vm0, %v904_v0 }
   0x2   :  { %81 = vst.msk [vmem:[#allocation2 + $0x10] sm:$0xff] %vm78_vm0, %v904_v0  ;;  %82 = vst.msk [vmem:[#allocation2 + $0x18] sm:$0xff] %vm78_vm0, %v904_v0  ;;  %p66_p1 = scmp.lt.s32.totalorder %s735_s28, 15  ;;  %p738_p2 = scmp.le.s32.totalorder %s1254_s1, 0 }
   0x3   :  { %83 = vst.msk [vmem:[#allocation2 + $0x20] sm:$0xff] %vm78_vm0, %v904_v0  ;;  %84 = vst.msk [vmem:[#allocation2 + $0x28] sm:$0xff] %vm78_vm0, %v904_v0  ;;  %s1262_s0 = smov (!%p57_p0, %s1253_s0), 0 }
   0x4   :  { %85 = vst.msk [vmem:[#allocation2 + $0x30] sm:$0xff] %vm78_vm0, %v904_v0  ;;  %86 = vst.msk [vmem:[#allocation2 + $0x38] sm:$0xff] %vm78_vm0, %v904_v0  ;;  %s1264_s28 = smov (!%p66_p1, %s735_s28), 15  ;;  %s734_s10 = sshll.u32 %s1262_s0, 2 }
   0x5   :  { %87 = vst.msk [vmem:[#allocation2 + $0x40] sm:$0xff] %vm78_vm0, %v904_v0  ;;  %88 = vst.msk [vmem:[#allocation2 + $0x48] sm:$0xff] %vm78_vm0, %v904_v0  ;;  %s978_s13 = scalar_lea.vmem %s1259_s2, %s734_s10  ;;  %s736_s14 = sshll.u32 %s1264_s28, 3 }
   0x6   :  { %89 = vst.msk [vmem:[#allocation2 + $0x50] sm:$0xff] %vm78_vm0, %v904_v0  ;;  %90 = vst.msk [vmem:[#allocation2 + $0x58] sm:$0xff] %vm78_vm0, %v904_v0  ;;  %s983_s17 = scalar_lea.vmem %s1260_s3, %s736_s14  ;;  %99 = sbr.rel (%p738_p2) target bundleno = 268 (0x10c), region = 29  ;;  %v894_v12 = vld [vmem:[%s978_s13] sm:$0xff] (!%p738_p2)   ;;  %v896_v27 = vld [vmem:[%s978_s13 + $0x8] sm:$0xff] (!%p738_p2)  }
   0x7   :  { %91 = vst.msk [vmem:[#allocation2 + $0x60] sm:$0xff] %vm78_vm0, %v904_v0  ;;  %92 = vst.msk [vmem:[#allocation2 + $0x68] sm:$0xff] %vm78_vm0, %v904_v0  ;;  %v132_v1 = vld [vmem:[%s983_s17] sm:$0xff] (!%p738_p2)  ;;  %v133_v2 = vld [vmem:[%s983_s17 + $0x8] sm:$0xff] (!%p738_p2)  ;;  %816 = vmatprep.mubr.bf16.mxu0 (!%p738_p2), %v894_v12 }
   0x8   :  { %93 = vst.msk [vmem:[#allocation2 + $0x70] sm:$0xff] %vm78_vm0, %v904_v0  ;;  %94 = vst.msk [vmem:[#allocation2 + $0x78] sm:$0xff] %vm78_vm0, %v904_v0  ;;  %v134_v3 = vld [vmem:[%s983_s17 + $0x10] sm:$0xff] (!%p738_p2)  ;;  %v148_v4 = vpack.c.bf16 (!%p738_p2), %v133_v2, %v132_v1  ;;  %v135_v5 = vld [vmem:[%s983_s17 + $0x18] sm:$0xff] (!%p738_p2) }
   0x9   :  { %v149_v6 = vpack.c.bf16 (!%p738_p2), %v135_v5, %v134_v3  ;;  %v136_v7 = vld [vmem:[%s983_s17 + $0x20] sm:$0xff] (!%p738_p2)  ;;  %v137_v8 = vld [vmem:[%s983_s17 + $0x28] sm:$0xff] (!%p738_p2)  ;;  %v138_v9 = vld [vmem:[%s983_s17 + $0x30] sm:$0xff] (!%p738_p2) }
   0xa   :  { %800 = vmatprep.subr.bf16.mxu0 (!%p738_p2), %v148_v4  ;;  %872 = vmatprep.subr.bf16.mxu1 (!%p738_p2), %v148_v4  ;;  %v150_v10 = vpack.c.bf16 (!%p738_p2), %v137_v8, %v136_v7  ;;  %v139_v11 = vld [vmem:[%s983_s17 + $0x38] sm:$0xff] (!%p738_p2)  ;;  %v895_v13 = vld [vmem:[%s978_s13 + $0x20] sm:$0xff] (!%p738_p2)   ;;  %v141_v16 = vld [vmem:[%s983_s17 + $0x48] sm:$0xff] (!%p738_p2) }
   0xb   :  { %801 = vmatpush3.bf16.msra.mxu0 (!%p738_p2), %v148_v4  ;;  %880 = vmatpush3.bf16.msra.mxu1 (!%p738_p2), %v148_v4  ;;  %v151_v14 = vpack.c.bf16 (!%p738_p2), %v139_v11, %v138_v9  ;;  %v140_v15 = vld [vmem:[%s983_s17 + $0x40] sm:$0xff] (!%p738_p2)  ;;  %v142_v18 = vld [vmem:[%s983_s17 + $0x50] sm:$0xff] (!%p738_p2)  ;;  %v143_v19 = vld [vmem:[%s983_s17 + $0x58] sm:$0xff] (!%p738_p2) }
   0xc   :  { %802 = vmatprep.subr.bf16.mxu0 (!%p738_p2), %v149_v6  ;;  %873 = vmatprep.subr.bf16.mxu1 (!%p738_p2), %v149_v6  ;;  %v152_v17 = vpack.c.bf16 (!%p738_p2), %v141_v16, %v140_v15  ;;  %v153_v20 = vpack.c.bf16 (!%p738_p2), %v143_v19, %v142_v18  ;;  %v144_v21 = vld [vmem:[%s983_s17 + $0x60] sm:$0xff] (!%p738_p2)  ;;  %v145_v22 = vld [vmem:[%s983_s17 + $0x68] sm:$0xff] (!%p738_p2)  ;;  %v146_v24 = vld [vmem:[%s983_s17 + $0x70] sm:$0xff] (!%p738_p2) }
   0xd   :  { %824 = vmatprep.mubr.bf16.mxu1 %v895_v13  ;;  %v154_v23 = vpack.c.bf16 %v145_v22, %v144_v21  ;;  %v147_v25 = vld [vmem:[%s983_s17 + $0x78] sm:$0xff]  ;;  %v897_v28 = vld [vmem:[%s978_s13 + $0x28] sm:$0xff]   ;;  %v898_v29 = vld [vmem:[%s978_s13 + $0x10] sm:$0xff]  }
   0xe   :  { %v155_v26 = vpack.c.bf16 %v147_v25, %v146_v24  ;;  %v899_v30 = vld [vmem:[%s978_s13 + $0x30] sm:$0xff]   ;;  %v900_v31 = vld [vmem:[%s978_s13 + $0x18] sm:$0xff]   ;;  %v100_v35 = vld [vmem:[#allocation2] sm:$0xff] }
   0xf   :  { %803 = vmatpush3.bf16.msra.mxu0 %v149_v6  ;;  %881 = vmatpush3.bf16.msra.mxu1 %v149_v6  ;;  %v901_v32 = vld [vmem:[%s978_s13 + $0x38] sm:$0xff]   ;;  %v102_v33 = vld [vmem:[#allocation2 + $0x10] sm:$0xff]  ;;  %v108_v36 = vld [vmem:[#allocation2 + $0x40] sm:$0xff] }
  0x10   :  { %804 = vmatprep.subr.bf16.mxu0 %v150_v10  ;;  %874 = vmatprep.subr.bf16.mxu1 %v150_v10  ;;  %v110_v34 = vld [vmem:[#allocation2 + $0x50] sm:$0xff]  ;;  %v103_v39 = vld [vmem:[#allocation2 + $0x18] sm:$0xff]  ;;  %v101_v45 = vld [vmem:[#allocation2 + $0x8] sm:$0xff] }
  0x11   :  { %v111_v40 = vld [vmem:[#allocation2 + $0x58] sm:$0xff]  ;;  %v109_v46 = vld [vmem:[#allocation2 + $0x48] sm:$0xff]  ;;  %v106_v57 = vld [vmem:[#allocation2 + $0x30] sm:$0xff] }
  0x12   :  { %v114_v58 = vld [vmem:[#allocation2 + $0x70] sm:$0xff]  ;;  %v104_v59 = vld [vmem:[#allocation2 + $0x20] sm:$0xff]  ;;  %v107_v63 = vld [vmem:[#allocation2 + $0x38] sm:$0xff] }
  0x13   :  { %805 = vmatpush3.bf16.msra.mxu0 %v150_v10  ;;  %882 = vmatpush3.bf16.msra.mxu1 %v150_v10  ;;  %v112_v60 = vld [vmem:[#allocation2 + $0x60] sm:$0xff]  ;;  %v115_v0 = vld [vmem:[#allocation2 + $0x78] sm:$0xff]  ;;  %v105_v5 = vld [vmem:[#allocation2 + $0x28] sm:$0xff] }
  0x14   :  { %806 = vmatprep.subr.bf16.mxu0 %v151_v14  ;;  %875 = vmatprep.subr.bf16.mxu1 %v151_v14  ;;  %v113_v6 = vld [vmem:[#allocation2 + $0x68] sm:$0xff] }
  0x17   :  { %807 = vmatpush3.bf16.msra.mxu0 %v151_v14  ;;  %883 = vmatpush3.bf16.msra.mxu1 %v151_v14 }
  0x18   :  { %808 = vmatprep.subr.bf16.mxu0 %v152_v17  ;;  %876 = vmatprep.subr.bf16.mxu1 %v152_v17 }
  0x1b   :  { %809 = vmatpush3.bf16.msra.mxu0 %v152_v17  ;;  %884 = vmatpush3.bf16.msra.mxu1 %v152_v17 }
  0x1c   :  { %810 = vmatprep.subr.bf16.mxu0 %v153_v20  ;;  %877 = vmatprep.subr.bf16.mxu1 %v153_v20 }
  0x1f   :  { %811 = vmatpush3.bf16.msra.mxu0 %v153_v20  ;;  %885 = vmatpush3.bf16.msra.mxu1 %v153_v20 }
  0x20   :  { %812 = vmatprep.subr.bf16.mxu0 %v154_v23  ;;  %878 = vmatprep.subr.bf16.mxu1 %v154_v23 }
  0x23   :  { %813 = vmatpush3.bf16.msra.mxu0 %v154_v23  ;;  %886 = vmatpush3.bf16.msra.mxu1 %v154_v23 }
  0x24   :  { %814 = vmatprep.subr.bf16.mxu0 %v155_v26  ;;  %879 = vmatprep.subr.bf16.mxu1 %v155_v26 }
  0x27   :  { %815 = vmatpush3.bf16.msra.mxu0 %v155_v26  ;;  %887 = vmatpush3.bf16.msra.mxu1 %v155_v26 }
  0x2a   :  { %817 = vmatmul.mubr.bf16.vlgmr.msra.gmra.mrb[0].mxu0 %v896_v27  ;;  %825 = vmatmul.mubr.bf16.vlgmr.msra.gmra.mrb[0].mxu1 %v897_v28 }
  0x2b   :  { %820 = vmatprep.mubr.bf16.mxu0 %v898_v29  ;;  %828 = vmatprep.mubr.bf16.mxu1 %v899_v30 }
  0x32   :  { %821 = vmatmul.mubr.bf16.gmra.mrb[4].mxu0 %v900_v31  ;;  %829 = vmatmul.mubr.bf16.gmra.mrb[4].mxu1 %v901_v32 }
  0xfd   :  { %v818_v37 = vpop.f32.mrb[0].mxu0  ;;  %v826_v38 = vpop.f32.mrb[0].mxu1 }
  0xfe   :  { %v303_v41 = vadd.f32 %v818_v37, %v102_v33  ;;  %v311_v42 = vadd.f32 %v826_v38, %v110_v34  ;;  %v238_v43 = vpop.f32.mrb[1].mxu0  ;;  %v270_v44 = vpop.f32.mrb[1].mxu1 }
  0xff   :  { %v301_v47 = vadd.f32 %v238_v43, %v100_v35  ;;  %v309_v48 = vadd.f32 %v270_v44, %v108_v36  ;;  %v819_v49 = vpop.f32.mrb[2].mxu0  ;;  %v827_v50 = vpop.f32.mrb[2].mxu1 }
 0x100   :  { %320 = vst.msk [vmem:[#allocation2 + $0x10] sm:$0xff] %vm78_vm0, %v303_v41  ;;  %328 = vst.msk [vmem:[#allocation2 + $0x50] sm:$0xff] %vm78_vm0, %v311_v42  ;;  %v304_v51 = vadd.f32 %v819_v49, %v103_v39  ;;  %v312_v52 = vadd.f32 %v827_v50, %v111_v40  ;;  %v241_v53 = vpop.f32.mrb[3].mxu0  ;;  %v273_v54 = vpop.f32.mrb[3].mxu1 }
 0x101   :  { %318 = vst.msk [vmem:[#allocation2] sm:$0xff] %vm78_vm0, %v301_v47  ;;  %326 = vst.msk [vmem:[#allocation2 + $0x40] sm:$0xff] %vm78_vm0, %v309_v48  ;;  %v302_v55 = vadd.f32 %v241_v53, %v101_v45  ;;  %v310_v56 = vadd.f32 %v273_v54, %v109_v46 }
 0x102   :  { %321 = vst.msk [vmem:[#allocation2 + $0x18] sm:$0xff] %vm78_vm0, %v304_v51  ;;  %329 = vst.msk [vmem:[#allocation2 + $0x58] sm:$0xff] %vm78_vm0, %v312_v52 }
 0x103   :  { %319 = vst.msk [vmem:[#allocation2 + $0x8] sm:$0xff] %vm78_vm0, %v302_v55  ;;  %327 = vst.msk [vmem:[#allocation2 + $0x48] sm:$0xff] %vm78_vm0, %v310_v56 }
 0x105   :  { %v822_v61 = vpop.f32.mrb[4].mxu0  ;;  %v830_v62 = vpop.f32.mrb[4].mxu1 }
 0x106   :  { %v307_v1 = vadd.f32 %v822_v61, %v106_v57  ;;  %v315_v2 = vadd.f32 %v830_v62, %v114_v58  ;;  %v254_v3 = vpop.f32.mrb[5].mxu0  ;;  %v286_v4 = vpop.f32.mrb[5].mxu1 }
 0x107   :  { %v305_v7 = vadd.f32 %v254_v3, %v104_v59  ;;  %v313_v8 = vadd.f32 %v286_v4, %v112_v60  ;;  %v823_v9 = vpop.f32.mrb[6].mxu0  ;;  %v831_v10 = vpop.f32.mrb[6].mxu1 }
 0x108   :  { %324 = vst.msk [vmem:[#allocation2 + $0x30] sm:$0xff] %vm78_vm0, %v307_v1  ;;  %332 = vst.msk [vmem:[#allocation2 + $0x70] sm:$0xff] %vm78_vm0, %v315_v2  ;;  %v308_v11 = vadd.f32 %v823_v9, %v107_v63  ;;  %v316_v12 = vadd.f32 %v831_v10, %v115_v0  ;;  %v257_v13 = vpop.f32.mrb[7].mxu0  ;;  %v289_v14 = vpop.f32.mrb[7].mxu1 }
 0x109   :  { %322 = vst.msk [vmem:[#allocation2 + $0x20] sm:$0xff] %vm78_vm0, %v305_v7  ;;  %330 = vst.msk [vmem:[#allocation2 + $0x60] sm:$0xff] %vm78_vm0, %v313_v8  ;;  %v306_v15 = vadd.f32 %v257_v13, %v105_v5  ;;  %v314_v16 = vadd.f32 %v289_v14, %v113_v6 }
 0x10a   :  { %325 = vst.msk [vmem:[#allocation2 + $0x38] sm:$0xff] %vm78_vm0, %v308_v11  ;;  %333 = vst.msk [vmem:[#allocation2 + $0x78] sm:$0xff] %vm78_vm0, %v316_v12 }
 0x10b   :  { %323 = vst.msk [vmem:[#allocation2 + $0x28] sm:$0xff] %vm78_vm0, %v306_v15  ;;  %331 = vst.msk [vmem:[#allocation2 + $0x68] sm:$0xff] %vm78_vm0, %v314_v16 }
 0x10c PF:  { %v354_v17 = vld [vmem:[%s1255_s4 + $0x8] sm:$0xff]  ;;  %v353_v18 = vld [vmem:[%s1255_s4] sm:$0xff]  ;;  %v905_v19 = vmov 0   ;;  %v467_v25 = vld [vmem:[%s1256_s5 + $0x10] sm:$0xff] }
 0x10d   :  { %903 = vset.pattern.permute.xlu1 %v905_v19  ;;  %902 = vset.pattern.permute.xlu0 %v905_v19  ;;  %v362_v20 = vld [vmem:[%s1255_s4 + $0x48] sm:$0xff]  ;;  %v361_v21 = vld [vmem:[%s1255_s4 + $0x40] sm:$0xff]  ;;  %v468_v26 = vld [vmem:[%s1256_s5 + $0x18] sm:$0xff] }
 0x10e   :  { %376 = vperm.xlu1 %903, %v354_v17   ;;  %371 = vperm.xlu0 %902, %v353_v18   ;;  %v465_v22 = vld [vmem:[%s1256_s5] sm:$0xff]  ;;  %v466_v23 = vld [vmem:[%s1256_s5 + $0x8] sm:$0xff]  ;;  %v363_v27 = vld [vmem:[%s1255_s4 + $0x50] sm:$0xff]  ;;  %v868_v29 = vpack.c.bf16 %v468_v26, %v467_v25 }
 0x10f   :  { %v864_v24 = vpack.c.bf16 %v466_v23, %v465_v22  ;;  %v355_v28 = vld [vmem:[%s1255_s4 + $0x10] sm:$0xff]  ;;  %v364_v30 = vld [vmem:[%s1255_s4 + $0x58] sm:$0xff]  ;;  %v365_v32 = vld [vmem:[%s1255_s4 + $0x60] sm:$0xff] }
 0x110   :  { %v356_v31 = vld [vmem:[%s1255_s4 + $0x18] sm:$0xff]  ;;  %v357_v33 = vld [vmem:[%s1255_s4 + $0x20] sm:$0xff]  ;;  %v366_v34 = vld [vmem:[%s1255_s4 + $0x68] sm:$0xff] }
 0x111   :  { %865 = vmatprep.subr.bf16.mxu0 %v864_v24  ;;  %888 = vmatprep.subr.bf16.mxu1 %v864_v24  ;;  %v358_v35 = vld [vmem:[%s1255_s4 + $0x28] sm:$0xff]  ;;  %v367_v36 = vld [vmem:[%s1255_s4 + $0x70] sm:$0xff]  ;;  %v368_v38 = vld [vmem:[%s1255_s4 + $0x78] sm:$0xff] }
 0x112   :  { %416 = vperm.xlu1 %903, %v362_v20   ;;  %411 = vperm.xlu0 %902, %v361_v21   ;;  %v359_v37 = vld [vmem:[%s1255_s4 + $0x30] sm:$0xff]  ;;  %v360_v39 = vld [vmem:[%s1255_s4 + $0x38] sm:$0xff]  ;;  %v338_v40 = vld [vmem:[#allocation2 + $0x8] sm:$0xff] }
 0x113   :  { %867 = vmatpush3.bf16.msra.mxu0 %v864_v24  ;;  %890 = vmatpush3.bf16.msra.mxu1 %v864_v24  ;;  %v337_v41 = vld [vmem:[#allocation2] sm:$0xff]  ;;  %v346_v46 = vld [vmem:[#allocation2 + $0x48] sm:$0xff]  ;;  %v347_v52 = vld [vmem:[#allocation2 + $0x50] sm:$0xff] }
 0x114   :  { %869 = vmatprep.subr.bf16.mxu0 %v868_v29  ;;  %889 = vmatprep.subr.bf16.mxu1 %v868_v29  ;;  %v345_v47 = vld [vmem:[#allocation2 + $0x40] sm:$0xff]  ;;  %v339_v53 = vld [vmem:[#allocation2 + $0x10] sm:$0xff]  ;;  %v348_v58 = vld [vmem:[#allocation2 + $0x58] sm:$0xff] }
 0x115   :  { %v340_v59 = vld [vmem:[#allocation2 + $0x18] sm:$0xff]  ;;  %v349_v0 = vld [vmem:[#allocation2 + $0x60] sm:$0xff]  ;;  %v350_v6 = vld [vmem:[#allocation2 + $0x68] sm:$0xff] }
 0x116   :  { %421 = vperm.xlu1 %903, %v363_v27   ;;  %381 = vperm.xlu0 %902, %v355_v28   ;;  %v341_v1 = vld [vmem:[#allocation2 + $0x20] sm:$0xff]  ;;  %v342_v7 = vld [vmem:[#allocation2 + $0x28] sm:$0xff]  ;;  %v351_v12 = vld [vmem:[#allocation2 + $0x70] sm:$0xff] }
 0x117   :  { %871 = vmatpush3.bf16.msra.mxu0 %v868_v29  ;;  %891 = vmatpush3.bf16.msra.mxu1 %v868_v29  ;;  %v343_v13 = vld [vmem:[#allocation2 + $0x30] sm:$0xff]  ;;  %v352_v18 = vld [vmem:[#allocation2 + $0x78] sm:$0xff]  ;;  %v1155_v24 = vld [vmem:[%s1257_s6] ss:$0 sm:$0xff] }
 0x118   :  { %v344_v19 = vld [vmem:[#allocation2 + $0x38] sm:$0xff] }
 0x11a   :  { %426 = vperm.xlu1 %903, %v364_v30   ;;  %386 = vperm.xlu0 %902, %v356_v31  }
 0x11e   :  { %431 = vperm.xlu1 %903, %v365_v32   ;;  %391 = vperm.xlu0 %902, %v357_v33  }
 0x122   :  { %436 = vperm.xlu1 %903, %v366_v34   ;;  %396 = vperm.xlu0 %902, %v358_v35  }
 0x126   :  { %441 = vperm.xlu1 %903, %v367_v36   ;;  %401 = vperm.xlu0 %902, %v359_v37  }
 0x12a   :  { %446 = vperm.xlu1 %903, %v368_v38   ;;  %406 = vperm.xlu0 %902, %v360_v39  }
 0x18d   :  { %v1088_v42 = vpop.permute.xlu1 %376  ;;  %v1090_v43 = vpop.permute.xlu0 %371 }
 0x18e   :  { %v450_v44 = vmul.f32 %v1088_v42, %v338_v40  ;;  %v449_v45 = vmul.f32 %v1090_v43, %v337_v41 }
 0x190   :  { %840 = vmatprep.mubr.msk.f32.mxu0 %vm78_vm0, %v449_v45 }
 0x191   :  { %v1095_v48 = vpop.permute.xlu1 %416  ;;  %v1097_v49 = vpop.permute.xlu0 %411  ;;  %841 = vmatmul.mubr.msk.f32.vlgmr.msra.gmra.mrb[0].mxu0 %vm78_vm0, %v450_v44 }
 0x192   :  { %v458_v50 = vmul.f32 %v1095_v48, %v346_v46  ;;  %v457_v51 = vmul.f32 %v1097_v49, %v345_v47 }
 0x194   :  { %852 = vmatprep.mubr.msk.f32.mxu1 %vm78_vm0, %v457_v51 }
 0x195   :  { %v1103_v54 = vpop.permute.xlu1 %421  ;;  %v1105_v55 = vpop.permute.xlu0 %381  ;;  %853 = vmatmul.mubr.msk.f32.vlgmr.msra.gmra.mrb[0].mxu1 %vm78_vm0, %v458_v50 }
 0x196   :  { %v459_v56 = vmul.f32 %v1103_v54, %v347_v52  ;;  %v451_v57 = vmul.f32 %v1105_v55, %v339_v53 }
 0x198   :  { %843 = vmatprep.mubr.msk.f32.mxu0 %vm78_vm0, %v451_v57  ;;  %855 = vmatprep.mubr.msk.f32.mxu1 %vm78_vm0, %v459_v56 }
 0x199   :  { %v1112_v60 = vpop.permute.xlu1 %426  ;;  %v1114_v61 = vpop.permute.xlu0 %386 }
 0x19a   :  { %v460_v62 = vmul.f32 %v1112_v60, %v348_v58  ;;  %v452_v63 = vmul.f32 %v1114_v61, %v340_v59 }
 0x19c   :  { %844 = vmatmul.mubr.msk.f32.gmra.mrb[2].mxu0 %vm78_vm0, %v452_v63  ;;  %856 = vmatmul.mubr.msk.f32.gmra.mrb[2].mxu1 %vm78_vm0, %v460_v62 }
 0x19d   :  { %v1120_v2 = vpop.permute.xlu1 %431  ;;  %v1122_v3 = vpop.permute.xlu0 %391 }
 0x19e   :  { %v461_v4 = vmul.f32 %v1120_v2, %v349_v0  ;;  %v453_v5 = vmul.f32 %v1122_v3, %v341_v1 }
 0x1a0   :  { %846 = vmatprep.mubr.msk.f32.mxu0 %vm78_vm0, %v453_v5  ;;  %858 = vmatprep.mubr.msk.f32.mxu1 %vm78_vm0, %v461_v4 }
 0x1a1   :  { %v1128_v8 = vpop.permute.xlu1 %436  ;;  %v1130_v9 = vpop.permute.xlu0 %396 }
 0x1a2   :  { %v462_v10 = vmul.f32 %v1128_v8, %v350_v6  ;;  %v454_v11 = vmul.f32 %v1130_v9, %v342_v7 }
 0x1a4   :  { %847 = vmatmul.mubr.msk.f32.gmra.mrb[4].mxu0 %vm78_vm0, %v454_v11  ;;  %859 = vmatmul.mubr.msk.f32.gmra.mrb[4].mxu1 %vm78_vm0, %v462_v10 }
 0x1a5   :  { %v1136_v14 = vpop.permute.xlu1 %441  ;;  %v1138_v15 = vpop.permute.xlu0 %401 }
 0x1a6   :  { %v463_v16 = vmul.f32 %v1136_v14, %v351_v12  ;;  %v455_v17 = vmul.f32 %v1138_v15, %v343_v13 }
 0x1a8   :  { %849 = vmatprep.mubr.msk.f32.mxu0 %vm78_vm0, %v455_v17  ;;  %861 = vmatprep.mubr.msk.f32.mxu1 %vm78_vm0, %v463_v16 }
 0x1a9   :  { %v1144_v20 = vpop.permute.xlu1 %446  ;;  %v1146_v21 = vpop.permute.xlu0 %406 }
 0x1aa   :  { %v464_v22 = vmul.f32 %v1144_v20, %v352_v18  ;;  %v456_v23 = vmul.f32 %v1146_v21, %v344_v19 }
 0x1ac   :  { %850 = vmatmul.mubr.msk.f32.gmra.mrb[6].mxu0 %vm78_vm0, %v456_v23  ;;  %862 = vmatmul.mubr.msk.f32.gmra.mrb[6].mxu1 %vm78_vm0, %v464_v22 }
 0x264   :  { %v842_v25 = vpop.f32.mrb[0].mxu0 }
 0x265   :  { %v597_v26 = vadd.f32 %v842_v25, %v1155_v24  ;;  %v591_v27 = vpop.f32.mrb[1].mxu0 }
 0x266   :  { %v592_v28 = vadd.f32 %v1155_v24, %v591_v27 }
 0x267   :  { %v671_v29 = vmax.f32 %v597_v26, 0.0 }
 0x268   :  { %v670_v30 = vmax.f32 %v592_v28, 0.0  ;;  %v854_v31 = vpop.f32.mrb[0].mxu1 }
 0x269   :  { %v687_v32 = vmul.f32 %v671_v29, %v1088_v42  ;;  %v637_v33 = vadd.f32 %v854_v31, %v1155_v24  ;;  %v631_v34 = vpop.f32.mrb[1].mxu1 }
 0x26a   :  { %v686_v35 = vmul.f32 %v670_v30, %v1090_v43  ;;  %v632_v36 = vadd.f32 %v1155_v24, %v631_v34 }
 0x26b   :  { %703 = vst.msk [vmem:[%s1258_s7 + $0x8] sm:$0xff] %vm78_vm0, %v687_v32  ;;  %v679_v37 = vmax.f32 %v637_v33, 0.0 }
 0x26c   :  { %702 = vst.msk [vmem:[%s1258_s7] sm:$0xff] %vm78_vm0, %v686_v35  ;;  %v678_v38 = vmax.f32 %v632_v36, 0.0 }
 0x26d   :  { %v695_v39 = vmul.f32 %v679_v37, %v1095_v48 }
 0x26e   :  { %v694_v40 = vmul.f32 %v678_v38, %v1097_v49 }
 0x26f   :  { %711 = vst.msk [vmem:[%s1258_s7 + $0x48] sm:$0xff] %vm78_vm0, %v695_v39  ;;  %v845_v41 = vpop.f32.mrb[2].mxu0  ;;  %v857_v42 = vpop.f32.mrb[2].mxu1 }
 0x270   :  { %710 = vst.msk [vmem:[%s1258_s7 + $0x40] sm:$0xff] %vm78_vm0, %v694_v40  ;;  %v607_v43 = vadd.f32 %v845_v41, %v1155_v24  ;;  %v647_v44 = vadd.f32 %v857_v42, %v1155_v24  ;;  %v601_v45 = vpop.f32.mrb[3].mxu0  ;;  %v641_v46 = vpop.f32.mrb[3].mxu1 }
 0x271   :  { %v602_v47 = vadd.f32 %v1155_v24, %v601_v45  ;;  %v642_v48 = vadd.f32 %v1155_v24, %v641_v46 }
 0x272   :  { %v673_v49 = vmax.f32 %v607_v43, 0.0  ;;  %v681_v50 = vmax.f32 %v647_v44, 0.0 }
 0x273   :  { %v672_v51 = vmax.f32 %v602_v47, 0.0  ;;  %v680_v52 = vmax.f32 %v642_v48, 0.0 }
 0x274   :  { %v689_v53 = vmul.f32 %v673_v49, %v1114_v61  ;;  %v697_v56 = vmul.f32 %v681_v50, %v1112_v60 }
 0x275   :  { %v688_v57 = vmul.f32 %v672_v51, %v1105_v55  ;;  %v696_v58 = vmul.f32 %v680_v52, %v1103_v54 }
 0x276   :  { %705 = vst.msk [vmem:[%s1258_s7 + $0x18] sm:$0xff] %vm78_vm0, %v689_v53  ;;  %713 = vst.msk [vmem:[%s1258_s7 + $0x58] sm:$0xff] %vm78_vm0, %v697_v56 }
 0x277   :  { %704 = vst.msk [vmem:[%s1258_s7 + $0x10] sm:$0xff] %vm78_vm0, %v688_v57  ;;  %712 = vst.msk [vmem:[%s1258_s7 + $0x50] sm:$0xff] %vm78_vm0, %v696_v58  ;;  %v848_v54 = vpop.f32.mrb[4].mxu0  ;;  %v860_v55 = vpop.f32.mrb[4].mxu1 }
 0x278   :  { %v617_v59 = vadd.f32 %v848_v54, %v1155_v24  ;;  %v657_v60 = vadd.f32 %v860_v55, %v1155_v24  ;;  %v611_v61 = vpop.f32.mrb[5].mxu0  ;;  %v651_v62 = vpop.f32.mrb[5].mxu1 }
 0x279   :  { %v612_v63 = vadd.f32 %v1155_v24, %v611_v61  ;;  %v652_v0 = vadd.f32 %v1155_v24, %v651_v62 }
 0x27a   :  { %v675_v1 = vmax.f32 %v617_v59, 0.0  ;;  %v683_v4 = vmax.f32 %v657_v60, 0.0 }
 0x27b   :  { %v674_v5 = vmax.f32 %v612_v63, 0.0  ;;  %v682_v6 = vmax.f32 %v652_v0, 0.0 }
 0x27c   :  { %v691_v7 = vmul.f32 %v675_v1, %v1130_v9  ;;  %v699_v10 = vmul.f32 %v683_v4, %v1128_v8 }
 0x27d   :  { %v690_v11 = vmul.f32 %v674_v5, %v1122_v3  ;;  %v698_v12 = vmul.f32 %v682_v6, %v1120_v2 }
 0x27e   :  { %707 = vst.msk [vmem:[%s1258_s7 + $0x28] sm:$0xff] %vm78_vm0, %v691_v7  ;;  %715 = vst.msk [vmem:[%s1258_s7 + $0x68] sm:$0xff] %vm78_vm0, %v699_v10 }
 0x27f   :  { %706 = vst.msk [vmem:[%s1258_s7 + $0x20] sm:$0xff] %vm78_vm0, %v690_v11  ;;  %714 = vst.msk [vmem:[%s1258_s7 + $0x60] sm:$0xff] %vm78_vm0, %v698_v12  ;;  %v851_v2 = vpop.f32.mrb[6].mxu0  ;;  %v863_v3 = vpop.f32.mrb[6].mxu1 }
 0x280   :  { %v627_v8 = vadd.f32 %v851_v2, %v1155_v24  ;;  %v667_v9 = vadd.f32 %v863_v3, %v1155_v24  ;;  %v621_v13 = vpop.f32.mrb[7].mxu0  ;;  %v661_v16 = vpop.f32.mrb[7].mxu1 }
 0x281   :  { %v622_v17 = vadd.f32 %v1155_v24, %v621_v13  ;;  %v662_v18 = vadd.f32 %v1155_v24, %v661_v16 }
 0x282   :  { %v677_v19 = vmax.f32 %v627_v8, 0.0  ;;  %v685_v22 = vmax.f32 %v667_v9, 0.0 }
 0x283   :  { %v676_v23 = vmax.f32 %v622_v17, 0.0  ;;  %v684_v25 = vmax.f32 %v662_v18, 0.0 }
 0x284   :  { %v693_v26 = vmul.f32 %v677_v19, %v1146_v21  ;;  %v701_v27 = vmul.f32 %v685_v22, %v1144_v20 }
 0x285   :  { %v692_v28 = vmul.f32 %v676_v23, %v1138_v15  ;;  %v700_v29 = vmul.f32 %v684_v25, %v1136_v14 }
 0x286   :  { %709 = vst.msk [vmem:[%s1258_s7 + $0x38] sm:$0xff] %vm78_vm0, %v693_v26  ;;  %717 = vst.msk [vmem:[%s1258_s7 + $0x78] sm:$0xff] %vm78_vm0, %v701_v27 }
 0x287   :  { %708 = vst.msk [vmem:[%s1258_s7 + $0x30] sm:$0xff] %vm78_vm0, %v692_v28  ;;  %716 = vst.msk [vmem:[%s1258_s7 + $0x70] sm:$0xff] %vm78_vm0, %v700_v29 }

// kernel: gcn3bn3mlp2_forward.6
= control target key start
LH: loop header
LB: loop body
LE: loop exit
PB: predicated region body
PF: predicated region fallthrough
CT: control target
= control target key end

     0   :  { %vm78_vm0 = vcmask 261120   ;;  %v888_v0 = vmov 0.0   ;;  %s1155_s0 = inlined_call_operand.<no memory space> [shape: s32[1], index: 0, kind: input, shape index: {}]   ;;  %s1156_s1 = inlined_call_operand.<no memory space> [shape: s32[1], index: 1, kind: input, shape index: {}]   ;;  %s1157_s4 = inlined_call_operand.vmem [shape: f32[128,1], index: 4, kind: input, shape index: {}]   ;;  %s1158_s5 = inlined_call_operand.vmem [shape: f32[32,32], index: 5, kind: input, shape index: {}]   ;;  %s1159_s6 = inlined_call_operand.vmem [shape: f32[1,32], index: 6, kind: input, shape index: {}]   ;;  %s1160_s7 = inlined_call_operand.vmem [shape: f32[128,32], index: 7, kind: output, shape index: {}]   ;;  %s1161_s2 = inlined_call_operand.vmem [shape: bf16[128,128], index: 2, kind: input, shape index: {}]   ;;  %s1162_s3 = inlined_call_operand.vmem [shape: f32[128,32], index: 3, kind: input, shape index: {}]  }
   0x1   :  { %p57_p0 = scmp.lt.s32.totalorder %s1155_s0, 0  ;;  %s719_s28 = sshll.u32 %s1155_s0, 4  ;;  %79 = vst.msk [vmem:[#allocation2] sm:$0xff] %vm78_vm0, %v888_v0  ;;  %80 = vst.msk [vmem:[#allocation2 + $0x8] sm:$0xff] %vm78_vm0, %v888_v0 }
   0x2   :  { %81 = vst.msk [vmem:[#allocation2 + $0x10] sm:$0xff] %vm78_vm0, %v888_v0  ;;  %82 = vst.msk [vmem:[#allocation2 + $0x18] sm:$0xff] %vm78_vm0, %v888_v0  ;;  %p66_p1 = scmp.lt.s32.totalorder %s719_s28, 15  ;;  %p722_p2 = scmp.le.s32.totalorder %s1156_s1, 0 }
   0x3   :  { %83 = vst.msk [vmem:[#allocation2 + $0x20] sm:$0xff] %vm78_vm0, %v888_v0  ;;  %84 = vst.msk [vmem:[#allocation2 + $0x28] sm:$0xff] %vm78_vm0, %v888_v0  ;;  %s1164_s0 = smov (!%p57_p0, %s1155_s0), 0 }
   0x4   :  { %85 = vst.msk [vmem:[#allocation2 + $0x30] sm:$0xff] %vm78_vm0, %v888_v0  ;;  %86 = vst.msk [vmem:[#allocation2 + $0x38] sm:$0xff] %vm78_vm0, %v888_v0  ;;  %s1166_s28 = smov (!%p66_p1, %s719_s28), 15  ;;  %s718_s10 = sshll.u32 %s1164_s0, 2 }
   0x5   :  { %87 = vst.msk [vmem:[#allocation2 + $0x40] sm:$0xff] %vm78_vm0, %v888_v0  ;;  %88 = vst.msk [vmem:[#allocation2 + $0x48] sm:$0xff] %vm78_vm0, %v888_v0  ;;  %s962_s13 = scalar_lea.vmem %s1161_s2, %s718_s10  ;;  %s720_s14 = sshll.u32 %s1166_s28, 3 }
   0x6   :  { %89 = vst.msk [vmem:[#allocation2 + $0x50] sm:$0xff] %vm78_vm0, %v888_v0  ;;  %90 = vst.msk [vmem:[#allocation2 + $0x58] sm:$0xff] %vm78_vm0, %v888_v0  ;;  %s967_s17 = scalar_lea.vmem %s1162_s3, %s720_s14  ;;  %99 = sbr.rel (%p722_p2) target bundleno = 268 (0x10c), region = 29  ;;  %v878_v12 = vld [vmem:[%s962_s13] sm:$0xff] (!%p722_p2)   ;;  %v880_v27 = vld [vmem:[%s962_s13 + $0x8] sm:$0xff] (!%p722_p2)  }
   0x7   :  { %91 = vst.msk [vmem:[#allocation2 + $0x60] sm:$0xff] %vm78_vm0, %v888_v0  ;;  %92 = vst.msk [vmem:[#allocation2 + $0x68] sm:$0xff] %vm78_vm0, %v888_v0  ;;  %v132_v1 = vld [vmem:[%s967_s17] sm:$0xff] (!%p722_p2)  ;;  %v133_v2 = vld [vmem:[%s967_s17 + $0x8] sm:$0xff] (!%p722_p2)  ;;  %800 = vmatprep.mubr.bf16.mxu0 (!%p722_p2), %v878_v12 }
   0x8   :  { %93 = vst.msk [vmem:[#allocation2 + $0x70] sm:$0xff] %vm78_vm0, %v888_v0  ;;  %94 = vst.msk [vmem:[#allocation2 + $0x78] sm:$0xff] %vm78_vm0, %v888_v0  ;;  %v134_v3 = vld [vmem:[%s967_s17 + $0x10] sm:$0xff] (!%p722_p2)  ;;  %v148_v4 = vpack.c.bf16 (!%p722_p2), %v133_v2, %v132_v1  ;;  %v135_v5 = vld [vmem:[%s967_s17 + $0x18] sm:$0xff] (!%p722_p2) }
   0x9   :  { %v149_v6 = vpack.c.bf16 (!%p722_p2), %v135_v5, %v134_v3  ;;  %v136_v7 = vld [vmem:[%s967_s17 + $0x20] sm:$0xff] (!%p722_p2)  ;;  %v137_v8 = vld [vmem:[%s967_s17 + $0x28] sm:$0xff] (!%p722_p2)  ;;  %v138_v9 = vld [vmem:[%s967_s17 + $0x30] sm:$0xff] (!%p722_p2) }
   0xa   :  { %784 = vmatprep.subr.bf16.mxu0 (!%p722_p2), %v148_v4  ;;  %856 = vmatprep.subr.bf16.mxu1 (!%p722_p2), %v148_v4  ;;  %v150_v10 = vpack.c.bf16 (!%p722_p2), %v137_v8, %v136_v7  ;;  %v139_v11 = vld [vmem:[%s967_s17 + $0x38] sm:$0xff] (!%p722_p2)  ;;  %v879_v13 = vld [vmem:[%s962_s13 + $0x20] sm:$0xff] (!%p722_p2)   ;;  %v141_v16 = vld [vmem:[%s967_s17 + $0x48] sm:$0xff] (!%p722_p2) }
   0xb   :  { %785 = vmatpush3.bf16.msra.mxu0 (!%p722_p2), %v148_v4  ;;  %864 = vmatpush3.bf16.msra.mxu1 (!%p722_p2), %v148_v4  ;;  %v151_v14 = vpack.c.bf16 (!%p722_p2), %v139_v11, %v138_v9  ;;  %v140_v15 = vld [vmem:[%s967_s17 + $0x40] sm:$0xff] (!%p722_p2)  ;;  %v142_v18 = vld [vmem:[%s967_s17 + $0x50] sm:$0xff] (!%p722_p2)  ;;  %v143_v19 = vld [vmem:[%s967_s17 + $0x58] sm:$0xff] (!%p722_p2) }
   0xc   :  { %786 = vmatprep.subr.bf16.mxu0 (!%p722_p2), %v149_v6  ;;  %857 = vmatprep.subr.bf16.mxu1 (!%p722_p2), %v149_v6  ;;  %v152_v17 = vpack.c.bf16 (!%p722_p2), %v141_v16, %v140_v15  ;;  %v153_v20 = vpack.c.bf16 (!%p722_p2), %v143_v19, %v142_v18  ;;  %v144_v21 = vld [vmem:[%s967_s17 + $0x60] sm:$0xff] (!%p722_p2)  ;;  %v145_v22 = vld [vmem:[%s967_s17 + $0x68] sm:$0xff] (!%p722_p2)  ;;  %v146_v24 = vld [vmem:[%s967_s17 + $0x70] sm:$0xff] (!%p722_p2) }
   0xd   :  { %808 = vmatprep.mubr.bf16.mxu1 %v879_v13  ;;  %v154_v23 = vpack.c.bf16 %v145_v22, %v144_v21  ;;  %v147_v25 = vld [vmem:[%s967_s17 + $0x78] sm:$0xff]  ;;  %v881_v28 = vld [vmem:[%s962_s13 + $0x28] sm:$0xff]   ;;  %v882_v29 = vld [vmem:[%s962_s13 + $0x10] sm:$0xff]  }
   0xe   :  { %v155_v26 = vpack.c.bf16 %v147_v25, %v146_v24  ;;  %v883_v30 = vld [vmem:[%s962_s13 + $0x30] sm:$0xff]   ;;  %v884_v31 = vld [vmem:[%s962_s13 + $0x18] sm:$0xff]   ;;  %v100_v35 = vld [vmem:[#allocation2] sm:$0xff] }
   0xf   :  { %787 = vmatpush3.bf16.msra.mxu0 %v149_v6  ;;  %865 = vmatpush3.bf16.msra.mxu1 %v149_v6  ;;  %v885_v32 = vld [vmem:[%s962_s13 + $0x38] sm:$0xff]   ;;  %v102_v33 = vld [vmem:[#allocation2 + $0x10] sm:$0xff]  ;;  %v108_v36 = vld [vmem:[#allocation2 + $0x40] sm:$0xff] }
  0x10   :  { %788 = vmatprep.subr.bf16.mxu0 %v150_v10  ;;  %858 = vmatprep.subr.bf16.mxu1 %v150_v10  ;;  %v110_v34 = vld [vmem:[#allocation2 + $0x50] sm:$0xff]  ;;  %v103_v39 = vld [vmem:[#allocation2 + $0x18] sm:$0xff]  ;;  %v101_v45 = vld [vmem:[#allocation2 + $0x8] sm:$0xff] }
  0x11   :  { %v111_v40 = vld [vmem:[#allocation2 + $0x58] sm:$0xff]  ;;  %v109_v46 = vld [vmem:[#allocation2 + $0x48] sm:$0xff]  ;;  %v106_v57 = vld [vmem:[#allocation2 + $0x30] sm:$0xff] }
  0x12   :  { %v114_v58 = vld [vmem:[#allocation2 + $0x70] sm:$0xff]  ;;  %v104_v59 = vld [vmem:[#allocation2 + $0x20] sm:$0xff]  ;;  %v107_v63 = vld [vmem:[#allocation2 + $0x38] sm:$0xff] }
  0x13   :  { %789 = vmatpush3.bf16.msra.mxu0 %v150_v10  ;;  %866 = vmatpush3.bf16.msra.mxu1 %v150_v10  ;;  %v112_v60 = vld [vmem:[#allocation2 + $0x60] sm:$0xff]  ;;  %v115_v0 = vld [vmem:[#allocation2 + $0x78] sm:$0xff]  ;;  %v105_v5 = vld [vmem:[#allocation2 + $0x28] sm:$0xff] }
  0x14   :  { %790 = vmatprep.subr.bf16.mxu0 %v151_v14  ;;  %859 = vmatprep.subr.bf16.mxu1 %v151_v14  ;;  %v113_v6 = vld [vmem:[#allocation2 + $0x68] sm:$0xff] }
  0x17   :  { %791 = vmatpush3.bf16.msra.mxu0 %v151_v14  ;;  %867 = vmatpush3.bf16.msra.mxu1 %v151_v14 }
  0x18   :  { %792 = vmatprep.subr.bf16.mxu0 %v152_v17  ;;  %860 = vmatprep.subr.bf16.mxu1 %v152_v17 }
  0x1b   :  { %793 = vmatpush3.bf16.msra.mxu0 %v152_v17  ;;  %868 = vmatpush3.bf16.msra.mxu1 %v152_v17 }
  0x1c   :  { %794 = vmatprep.subr.bf16.mxu0 %v153_v20  ;;  %861 = vmatprep.subr.bf16.mxu1 %v153_v20 }
  0x1f   :  { %795 = vmatpush3.bf16.msra.mxu0 %v153_v20  ;;  %869 = vmatpush3.bf16.msra.mxu1 %v153_v20 }
  0x20   :  { %796 = vmatprep.subr.bf16.mxu0 %v154_v23  ;;  %862 = vmatprep.subr.bf16.mxu1 %v154_v23 }
  0x23   :  { %797 = vmatpush3.bf16.msra.mxu0 %v154_v23  ;;  %870 = vmatpush3.bf16.msra.mxu1 %v154_v23 }
  0x24   :  { %798 = vmatprep.subr.bf16.mxu0 %v155_v26  ;;  %863 = vmatprep.subr.bf16.mxu1 %v155_v26 }
  0x27   :  { %799 = vmatpush3.bf16.msra.mxu0 %v155_v26  ;;  %871 = vmatpush3.bf16.msra.mxu1 %v155_v26 }
  0x2a   :  { %801 = vmatmul.mubr.bf16.vlgmr.msra.gmra.mrb[0].mxu0 %v880_v27  ;;  %809 = vmatmul.mubr.bf16.vlgmr.msra.gmra.mrb[0].mxu1 %v881_v28 }
  0x2b   :  { %804 = vmatprep.mubr.bf16.mxu0 %v882_v29  ;;  %812 = vmatprep.mubr.bf16.mxu1 %v883_v30 }
  0x32   :  { %805 = vmatmul.mubr.bf16.gmra.mrb[4].mxu0 %v884_v31  ;;  %813 = vmatmul.mubr.bf16.gmra.mrb[4].mxu1 %v885_v32 }
  0xfd   :  { %v802_v37 = vpop.f32.mrb[0].mxu0  ;;  %v810_v38 = vpop.f32.mrb[0].mxu1 }
  0xfe   :  { %v303_v41 = vadd.f32 %v802_v37, %v102_v33  ;;  %v311_v42 = vadd.f32 %v810_v38, %v110_v34  ;;  %v238_v43 = vpop.f32.mrb[1].mxu0  ;;  %v270_v44 = vpop.f32.mrb[1].mxu1 }
  0xff   :  { %v301_v47 = vadd.f32 %v238_v43, %v100_v35  ;;  %v309_v48 = vadd.f32 %v270_v44, %v108_v36  ;;  %v803_v49 = vpop.f32.mrb[2].mxu0  ;;  %v811_v50 = vpop.f32.mrb[2].mxu1 }
 0x100   :  { %320 = vst.msk [vmem:[#allocation2 + $0x10] sm:$0xff] %vm78_vm0, %v303_v41  ;;  %328 = vst.msk [vmem:[#allocation2 + $0x50] sm:$0xff] %vm78_vm0, %v311_v42  ;;  %v304_v51 = vadd.f32 %v803_v49, %v103_v39  ;;  %v312_v52 = vadd.f32 %v811_v50, %v111_v40  ;;  %v241_v53 = vpop.f32.mrb[3].mxu0  ;;  %v273_v54 = vpop.f32.mrb[3].mxu1 }
 0x101   :  { %318 = vst.msk [vmem:[#allocation2] sm:$0xff] %vm78_vm0, %v301_v47  ;;  %326 = vst.msk [vmem:[#allocation2 + $0x40] sm:$0xff] %vm78_vm0, %v309_v48  ;;  %v302_v55 = vadd.f32 %v241_v53, %v101_v45  ;;  %v310_v56 = vadd.f32 %v273_v54, %v109_v46 }
 0x102   :  { %321 = vst.msk [vmem:[#allocation2 + $0x18] sm:$0xff] %vm78_vm0, %v304_v51  ;;  %329 = vst.msk [vmem:[#allocation2 + $0x58] sm:$0xff] %vm78_vm0, %v312_v52 }
 0x103   :  { %319 = vst.msk [vmem:[#allocation2 + $0x8] sm:$0xff] %vm78_vm0, %v302_v55  ;;  %327 = vst.msk [vmem:[#allocation2 + $0x48] sm:$0xff] %vm78_vm0, %v310_v56 }
 0x105   :  { %v806_v61 = vpop.f32.mrb[4].mxu0  ;;  %v814_v62 = vpop.f32.mrb[4].mxu1 }
 0x106   :  { %v307_v1 = vadd.f32 %v806_v61, %v106_v57  ;;  %v315_v2 = vadd.f32 %v814_v62, %v114_v58  ;;  %v254_v3 = vpop.f32.mrb[5].mxu0  ;;  %v286_v4 = vpop.f32.mrb[5].mxu1 }
 0x107   :  { %v305_v7 = vadd.f32 %v254_v3, %v104_v59  ;;  %v313_v8 = vadd.f32 %v286_v4, %v112_v60  ;;  %v807_v9 = vpop.f32.mrb[6].mxu0  ;;  %v815_v10 = vpop.f32.mrb[6].mxu1 }
 0x108   :  { %324 = vst.msk [vmem:[#allocation2 + $0x30] sm:$0xff] %vm78_vm0, %v307_v1  ;;  %332 = vst.msk [vmem:[#allocation2 + $0x70] sm:$0xff] %vm78_vm0, %v315_v2  ;;  %v308_v11 = vadd.f32 %v807_v9, %v107_v63  ;;  %v316_v12 = vadd.f32 %v815_v10, %v115_v0  ;;  %v257_v13 = vpop.f32.mrb[7].mxu0  ;;  %v289_v14 = vpop.f32.mrb[7].mxu1 }
 0x109   :  { %322 = vst.msk [vmem:[#allocation2 + $0x20] sm:$0xff] %vm78_vm0, %v305_v7  ;;  %330 = vst.msk [vmem:[#allocation2 + $0x60] sm:$0xff] %vm78_vm0, %v313_v8  ;;  %v306_v15 = vadd.f32 %v257_v13, %v105_v5  ;;  %v314_v16 = vadd.f32 %v289_v14, %v113_v6 }
 0x10a   :  { %325 = vst.msk [vmem:[#allocation2 + $0x38] sm:$0xff] %vm78_vm0, %v308_v11  ;;  %333 = vst.msk [vmem:[#allocation2 + $0x78] sm:$0xff] %vm78_vm0, %v316_v12 }
 0x10b   :  { %323 = vst.msk [vmem:[#allocation2 + $0x28] sm:$0xff] %vm78_vm0, %v306_v15  ;;  %331 = vst.msk [vmem:[#allocation2 + $0x68] sm:$0xff] %vm78_vm0, %v314_v16 }
 0x10c PF:  { %v354_v17 = vld [vmem:[%s1157_s4 + $0x8] sm:$0xff]  ;;  %v353_v18 = vld [vmem:[%s1157_s4] sm:$0xff]  ;;  %v889_v19 = vmov 0   ;;  %v467_v25 = vld [vmem:[%s1158_s5 + $0x10] sm:$0xff] }
 0x10d   :  { %887 = vset.pattern.permute.xlu1 %v889_v19  ;;  %886 = vset.pattern.permute.xlu0 %v889_v19  ;;  %v362_v20 = vld [vmem:[%s1157_s4 + $0x48] sm:$0xff]  ;;  %v361_v21 = vld [vmem:[%s1157_s4 + $0x40] sm:$0xff]  ;;  %v468_v26 = vld [vmem:[%s1158_s5 + $0x18] sm:$0xff] }
 0x10e   :  { %376 = vperm.xlu1 %887, %v354_v17   ;;  %371 = vperm.xlu0 %886, %v353_v18   ;;  %v465_v22 = vld [vmem:[%s1158_s5] sm:$0xff]  ;;  %v466_v23 = vld [vmem:[%s1158_s5 + $0x8] sm:$0xff]  ;;  %v363_v27 = vld [vmem:[%s1157_s4 + $0x50] sm:$0xff]  ;;  %v852_v29 = vpack.c.bf16 %v468_v26, %v467_v25 }
 0x10f   :  { %v848_v24 = vpack.c.bf16 %v466_v23, %v465_v22  ;;  %v355_v28 = vld [vmem:[%s1157_s4 + $0x10] sm:$0xff]  ;;  %v364_v30 = vld [vmem:[%s1157_s4 + $0x58] sm:$0xff]  ;;  %v365_v32 = vld [vmem:[%s1157_s4 + $0x60] sm:$0xff] }
 0x110   :  { %v356_v31 = vld [vmem:[%s1157_s4 + $0x18] sm:$0xff]  ;;  %v357_v33 = vld [vmem:[%s1157_s4 + $0x20] sm:$0xff]  ;;  %v366_v34 = vld [vmem:[%s1157_s4 + $0x68] sm:$0xff] }
 0x111   :  { %849 = vmatprep.subr.bf16.mxu0 %v848_v24  ;;  %872 = vmatprep.subr.bf16.mxu1 %v848_v24  ;;  %v358_v35 = vld [vmem:[%s1157_s4 + $0x28] sm:$0xff]  ;;  %v367_v36 = vld [vmem:[%s1157_s4 + $0x70] sm:$0xff]  ;;  %v368_v38 = vld [vmem:[%s1157_s4 + $0x78] sm:$0xff] }
 0x112   :  { %416 = vperm.xlu1 %887, %v362_v20   ;;  %411 = vperm.xlu0 %886, %v361_v21   ;;  %v359_v37 = vld [vmem:[%s1157_s4 + $0x30] sm:$0xff]  ;;  %v360_v39 = vld [vmem:[%s1157_s4 + $0x38] sm:$0xff]  ;;  %v338_v40 = vld [vmem:[#allocation2 + $0x8] sm:$0xff] }
 0x113   :  { %851 = vmatpush3.bf16.msra.mxu0 %v848_v24  ;;  %874 = vmatpush3.bf16.msra.mxu1 %v848_v24  ;;  %v337_v41 = vld [vmem:[#allocation2] sm:$0xff]  ;;  %v346_v46 = vld [vmem:[#allocation2 + $0x48] sm:$0xff]  ;;  %v347_v52 = vld [vmem:[#allocation2 + $0x50] sm:$0xff] }
 0x114   :  { %853 = vmatprep.subr.bf16.mxu0 %v852_v29  ;;  %873 = vmatprep.subr.bf16.mxu1 %v852_v29  ;;  %v345_v47 = vld [vmem:[#allocation2 + $0x40] sm:$0xff]  ;;  %v339_v53 = vld [vmem:[#allocation2 + $0x10] sm:$0xff]  ;;  %v348_v58 = vld [vmem:[#allocation2 + $0x58] sm:$0xff] }
 0x115   :  { %v340_v59 = vld [vmem:[#allocation2 + $0x18] sm:$0xff]  ;;  %v349_v0 = vld [vmem:[#allocation2 + $0x60] sm:$0xff]  ;;  %v350_v6 = vld [vmem:[#allocation2 + $0x68] sm:$0xff] }
 0x116   :  { %421 = vperm.xlu1 %887, %v363_v27   ;;  %381 = vperm.xlu0 %886, %v355_v28   ;;  %v341_v1 = vld [vmem:[#allocation2 + $0x20] sm:$0xff]  ;;  %v342_v7 = vld [vmem:[#allocation2 + $0x28] sm:$0xff]  ;;  %v351_v12 = vld [vmem:[#allocation2 + $0x70] sm:$0xff] }
 0x117   :  { %855 = vmatpush3.bf16.msra.mxu0 %v852_v29  ;;  %875 = vmatpush3.bf16.msra.mxu1 %v852_v29  ;;  %v343_v13 = vld [vmem:[#allocation2 + $0x30] sm:$0xff]  ;;  %v352_v18 = vld [vmem:[#allocation2 + $0x78] sm:$0xff]  ;;  %v731_v24 = vld [vmem:[%s1159_s6] ss:$0 sm:$0xff] }
 0x118   :  { %v344_v19 = vld [vmem:[#allocation2 + $0x38] sm:$0xff] }
 0x11a   :  { %426 = vperm.xlu1 %887, %v364_v30   ;;  %386 = vperm.xlu0 %886, %v356_v31  }
 0x11e   :  { %431 = vperm.xlu1 %887, %v365_v32   ;;  %391 = vperm.xlu0 %886, %v357_v33  }
 0x122   :  { %436 = vperm.xlu1 %887, %v366_v34   ;;  %396 = vperm.xlu0 %886, %v358_v35  }
 0x126   :  { %441 = vperm.xlu1 %887, %v367_v36   ;;  %401 = vperm.xlu0 %886, %v359_v37  }
 0x12a   :  { %446 = vperm.xlu1 %887, %v368_v38   ;;  %406 = vperm.xlu0 %886, %v360_v39  }
 0x18d   :  { %v377_v42 = vpop.permute.xlu1 %376  ;;  %v372_v43 = vpop.permute.xlu0 %371 }
 0x18e   :  { %v450_v44 = vmul.f32 %v377_v42, %v338_v40  ;;  %v449_v45 = vmul.f32 %v372_v43, %v337_v41 }
 0x190   :  { %824 = vmatprep.mubr.msk.f32.mxu0 %vm78_vm0, %v449_v45 }
 0x191   :  { %v417_v48 = vpop.permute.xlu1 %416  ;;  %v412_v49 = vpop.permute.xlu0 %411  ;;  %825 = vmatmul.mubr.msk.f32.vlgmr.msra.gmra.mrb[0].mxu0 %vm78_vm0, %v450_v44 }
 0x192   :  { %v458_v50 = vmul.f32 %v417_v48, %v346_v46  ;;  %v457_v51 = vmul.f32 %v412_v49, %v345_v47 }
 0x194   :  { %836 = vmatprep.mubr.msk.f32.mxu1 %vm78_vm0, %v457_v51 }
 0x195   :  { %v422_v54 = vpop.permute.xlu1 %421  ;;  %v382_v55 = vpop.permute.xlu0 %381  ;;  %837 = vmatmul.mubr.msk.f32.vlgmr.msra.gmra.mrb[0].mxu1 %vm78_vm0, %v458_v50 }
 0x196   :  { %v459_v56 = vmul.f32 %v422_v54, %v347_v52  ;;  %v451_v57 = vmul.f32 %v382_v55, %v339_v53 }
 0x198   :  { %827 = vmatprep.mubr.msk.f32.mxu0 %vm78_vm0, %v451_v57  ;;  %839 = vmatprep.mubr.msk.f32.mxu1 %vm78_vm0, %v459_v56 }
 0x199   :  { %v427_v60 = vpop.permute.xlu1 %426  ;;  %v387_v61 = vpop.permute.xlu0 %386 }
 0x19a   :  { %v460_v62 = vmul.f32 %v427_v60, %v348_v58  ;;  %v452_v63 = vmul.f32 %v387_v61, %v340_v59 }
 0x19c   :  { %828 = vmatmul.mubr.msk.f32.gmra.mrb[2].mxu0 %vm78_vm0, %v452_v63  ;;  %840 = vmatmul.mubr.msk.f32.gmra.mrb[2].mxu1 %vm78_vm0, %v460_v62 }
 0x19d   :  { %v432_v2 = vpop.permute.xlu1 %431  ;;  %v392_v3 = vpop.permute.xlu0 %391 }
 0x19e   :  { %v461_v4 = vmul.f32 %v432_v2, %v349_v0  ;;  %v453_v5 = vmul.f32 %v392_v3, %v341_v1 }
 0x1a0   :  { %830 = vmatprep.mubr.msk.f32.mxu0 %vm78_vm0, %v453_v5  ;;  %842 = vmatprep.mubr.msk.f32.mxu1 %vm78_vm0, %v461_v4 }
 0x1a1   :  { %v437_v8 = vpop.permute.xlu1 %436  ;;  %v397_v9 = vpop.permute.xlu0 %396 }
 0x1a2   :  { %v462_v10 = vmul.f32 %v437_v8, %v350_v6  ;;  %v454_v11 = vmul.f32 %v397_v9, %v342_v7 }
 0x1a4   :  { %831 = vmatmul.mubr.msk.f32.gmra.mrb[4].mxu0 %vm78_vm0, %v454_v11  ;;  %843 = vmatmul.mubr.msk.f32.gmra.mrb[4].mxu1 %vm78_vm0, %v462_v10 }
 0x1a5   :  { %v442_v14 = vpop.permute.xlu1 %441  ;;  %v402_v15 = vpop.permute.xlu0 %401 }
 0x1a6   :  { %v463_v16 = vmul.f32 %v442_v14, %v351_v12  ;;  %v455_v17 = vmul.f32 %v402_v15, %v343_v13 }
 0x1a8   :  { %833 = vmatprep.mubr.msk.f32.mxu0 %vm78_vm0, %v455_v17  ;;  %845 = vmatprep.mubr.msk.f32.mxu1 %vm78_vm0, %v463_v16 }
 0x1a9   :  { %v447_v20 = vpop.permute.xlu1 %446  ;;  %v407_v21 = vpop.permute.xlu0 %406 }
 0x1aa   :  { %v464_v22 = vmul.f32 %v447_v20, %v352_v18  ;;  %v456_v23 = vmul.f32 %v407_v21, %v344_v19 }
 0x1ac   :  { %834 = vmatmul.mubr.msk.f32.gmra.mrb[6].mxu0 %vm78_vm0, %v456_v23  ;;  %846 = vmatmul.mubr.msk.f32.gmra.mrb[6].mxu1 %vm78_vm0, %v464_v22 }
 0x264   :  { %v826_v25 = vpop.f32.mrb[0].mxu0 }
 0x265   :  { %v597_v26 = vadd.f32 %v826_v25, %v731_v24  ;;  %v591_v27 = vpop.f32.mrb[1].mxu0 }
 0x266   :  { %v592_v28 = vadd.f32 %v731_v24, %v591_v27 }
 0x267   :  { %v671_v29 = vmax.f32 %v597_v26, 0.0 }
 0x268   :  { %v670_v30 = vmax.f32 %v592_v28, 0.0  ;;  %v838_v31 = vpop.f32.mrb[0].mxu1 }
 0x269   :  { %687 = vst.msk [vmem:[%s1160_s7 + $0x8] sm:$0xff] %vm78_vm0, %v671_v29  ;;  %v637_v32 = vadd.f32 %v838_v31, %v731_v24  ;;  %v631_v33 = vpop.f32.mrb[1].mxu1 }
 0x26a   :  { %686 = vst.msk [vmem:[%s1160_s7] sm:$0xff] %vm78_vm0, %v670_v30  ;;  %v632_v34 = vadd.f32 %v731_v24, %v631_v33 }
 0x26b   :  { %v679_v35 = vmax.f32 %v637_v32, 0.0 }
 0x26c   :  { %v678_v36 = vmax.f32 %v632_v34, 0.0 }
 0x26d   :  { %695 = vst.msk [vmem:[%s1160_s7 + $0x48] sm:$0xff] %vm78_vm0, %v679_v35 }
 0x26e   :  { %694 = vst.msk [vmem:[%s1160_s7 + $0x40] sm:$0xff] %vm78_vm0, %v678_v36 }
 0x26f   :  { %v829_v37 = vpop.f32.mrb[2].mxu0  ;;  %v841_v38 = vpop.f32.mrb[2].mxu1 }
 0x270   :  { %v607_v39 = vadd.f32 %v829_v37, %v731_v24  ;;  %v647_v40 = vadd.f32 %v841_v38, %v731_v24  ;;  %v601_v41 = vpop.f32.mrb[3].mxu0  ;;  %v641_v42 = vpop.f32.mrb[3].mxu1 }
 0x271   :  { %v602_v43 = vadd.f32 %v731_v24, %v601_v41  ;;  %v642_v44 = vadd.f32 %v731_v24, %v641_v42 }
 0x272   :  { %v673_v45 = vmax.f32 %v607_v39, 0.0  ;;  %v681_v46 = vmax.f32 %v647_v40, 0.0 }
 0x273   :  { %v672_v47 = vmax.f32 %v602_v43, 0.0  ;;  %v680_v48 = vmax.f32 %v642_v44, 0.0 }
 0x274   :  { %689 = vst.msk [vmem:[%s1160_s7 + $0x18] sm:$0xff] %vm78_vm0, %v673_v45  ;;  %697 = vst.msk [vmem:[%s1160_s7 + $0x58] sm:$0xff] %vm78_vm0, %v681_v46 }
 0x275   :  { %688 = vst.msk [vmem:[%s1160_s7 + $0x10] sm:$0xff] %vm78_vm0, %v672_v47  ;;  %696 = vst.msk [vmem:[%s1160_s7 + $0x50] sm:$0xff] %vm78_vm0, %v680_v48 }
 0x277   :  { %v832_v49 = vpop.f32.mrb[4].mxu0  ;;  %v844_v50 = vpop.f32.mrb[4].mxu1 }
 0x278   :  { %v617_v51 = vadd.f32 %v832_v49, %v731_v24  ;;  %v657_v52 = vadd.f32 %v844_v50, %v731_v24  ;;  %v611_v53 = vpop.f32.mrb[5].mxu0  ;;  %v651_v54 = vpop.f32.mrb[5].mxu1 }
 0x279   :  { %v612_v55 = vadd.f32 %v731_v24, %v611_v53  ;;  %v652_v56 = vadd.f32 %v731_v24, %v651_v54 }
 0x27a   :  { %v675_v57 = vmax.f32 %v617_v51, 0.0  ;;  %v683_v58 = vmax.f32 %v657_v52, 0.0 }
 0x27b   :  { %v674_v59 = vmax.f32 %v612_v55, 0.0  ;;  %v682_v60 = vmax.f32 %v652_v56, 0.0 }
 0x27c   :  { %691 = vst.msk [vmem:[%s1160_s7 + $0x28] sm:$0xff] %vm78_vm0, %v675_v57  ;;  %699 = vst.msk [vmem:[%s1160_s7 + $0x68] sm:$0xff] %vm78_vm0, %v683_v58 }
 0x27d   :  { %690 = vst.msk [vmem:[%s1160_s7 + $0x20] sm:$0xff] %vm78_vm0, %v674_v59  ;;  %698 = vst.msk [vmem:[%s1160_s7 + $0x60] sm:$0xff] %vm78_vm0, %v682_v60 }
 0x27f   :  { %v835_v61 = vpop.f32.mrb[6].mxu0  ;;  %v847_v62 = vpop.f32.mrb[6].mxu1 }
 0x280   :  { %v627_v63 = vadd.f32 %v835_v61, %v731_v24  ;;  %v667_v0 = vadd.f32 %v847_v62, %v731_v24  ;;  %v621_v1 = vpop.f32.mrb[7].mxu0  ;;  %v661_v2 = vpop.f32.mrb[7].mxu1 }
 0x281   :  { %v622_v3 = vadd.f32 %v731_v24, %v621_v1  ;;  %v662_v4 = vadd.f32 %v731_v24, %v661_v2 }
 0x282   :  { %v677_v5 = vmax.f32 %v627_v63, 0.0  ;;  %v685_v6 = vmax.f32 %v667_v0, 0.0 }
 0x283   :  { %v676_v7 = vmax.f32 %v622_v3, 0.0  ;;  %v684_v8 = vmax.f32 %v662_v4, 0.0 }
 0x284   :  { %693 = vst.msk [vmem:[%s1160_s7 + $0x38] sm:$0xff] %vm78_vm0, %v677_v5  ;;  %701 = vst.msk [vmem:[%s1160_s7 + $0x78] sm:$0xff] %vm78_vm0, %v685_v6 }
 0x285   :  { %692 = vst.msk [vmem:[%s1160_s7 + $0x30] sm:$0xff] %vm78_vm0, %v676_v7  ;;  %700 = vst.msk [vmem:[%s1160_s7 + $0x70] sm:$0xff] %vm78_vm0, %v684_v8 }

// kernel: gcn3bn3mlp2_forward.4
= control target key start
LH: loop header
LB: loop body
LE: loop exit
PB: predicated region body
PF: predicated region fallthrough
CT: control target
= control target key end

     0   :  { %vm78_vm0 = vcmask 130048   ;;  %v891_v0 = vmov 0.0   ;;  %s1234_s0 = inlined_call_operand.<no memory space> [shape: s32[1], index: 0, kind: input, shape index: {}]   ;;  %s1235_s1 = inlined_call_operand.<no memory space> [shape: s32[1], index: 1, kind: input, shape index: {}]   ;;  %s1236_s4 = inlined_call_operand.vmem [shape: f32[128,1], index: 4, kind: input, shape index: {}]   ;;  %s1237_s5 = inlined_call_operand.vmem [shape: f32[16,32], index: 5, kind: input, shape index: {}]   ;;  %s1238_s6 = inlined_call_operand.vmem [shape: f32[1,32], index: 6, kind: input, shape index: {}]   ;;  %s1239_s7 = inlined_call_operand.vmem [shape: f32[128,32], index: 7, kind: output, shape index: {}]   ;;  %s1240_s2 = inlined_call_operand.vmem [shape: bf16[128,128], index: 2, kind: input, shape index: {}]   ;;  %s1241_s3 = inlined_call_operand.vmem [shape: f32[128,16], index: 3, kind: input, shape index: {}]  }
   0x1   :  { %p57_p0 = scmp.lt.s32.totalorder %s1234_s0, 0  ;;  %s734_s28 = sshll.u32 %s1234_s0, 4  ;;  %79 = vst.msk [vmem:[#allocation2] sm:$0xff] %vm78_vm0, %v891_v0  ;;  %80 = vst.msk [vmem:[#allocation2 + $0x8] sm:$0xff] %vm78_vm0, %v891_v0 }
   0x2   :  { %81 = vst.msk [vmem:[#allocation2 + $0x10] sm:$0xff] %vm78_vm0, %v891_v0  ;;  %82 = vst.msk [vmem:[#allocation2 + $0x18] sm:$0xff] %vm78_vm0, %v891_v0  ;;  %p66_p1 = scmp.lt.s32.totalorder %s734_s28, 15  ;;  %p737_p2 = scmp.le.s32.totalorder %s1235_s1, 0 }
   0x3   :  { %83 = vst.msk [vmem:[#allocation2 + $0x20] sm:$0xff] %vm78_vm0, %v891_v0  ;;  %84 = vst.msk [vmem:[#allocation2 + $0x28] sm:$0xff] %vm78_vm0, %v891_v0  ;;  %s1243_s0 = smov (!%p57_p0, %s1234_s0), 0 }
   0x4   :  { %85 = vst.msk [vmem:[#allocation2 + $0x30] sm:$0xff] %vm78_vm0, %v891_v0  ;;  %86 = vst.msk [vmem:[#allocation2 + $0x38] sm:$0xff] %vm78_vm0, %v891_v0  ;;  %s1245_s28 = smov (!%p66_p1, %s734_s28), 15  ;;  %s733_s10 = sshll.u32 %s1243_s0, 2 }
   0x5   :  { %87 = vst.msk [vmem:[#allocation2 + $0x40] sm:$0xff] %vm78_vm0, %v891_v0  ;;  %88 = vst.msk [vmem:[#allocation2 + $0x48] sm:$0xff] %vm78_vm0, %v891_v0  ;;  %s965_s13 = scalar_lea.vmem %s1240_s2, %s733_s10  ;;  %s735_s14 = sshll.u32 %s1245_s28, 3 }
   0x6   :  { %89 = vst.msk [vmem:[#allocation2 + $0x50] sm:$0xff] %vm78_vm0, %v891_v0  ;;  %90 = vst.msk [vmem:[#allocation2 + $0x58] sm:$0xff] %vm78_vm0, %v891_v0  ;;  %s970_s17 = scalar_lea.vmem %s1241_s3, %s735_s14  ;;  %99 = sbr.rel (%p737_p2) target bundleno = 268 (0x10c), region = 29  ;;  %v881_v12 = vld [vmem:[%s965_s13] sm:$0xff] (!%p737_p2)   ;;  %v883_v27 = vld [vmem:[%s965_s13 + $0x8] sm:$0xff] (!%p737_p2)  }
   0x7   :  { %91 = vst.msk [vmem:[#allocation2 + $0x60] sm:$0xff] %vm78_vm0, %v891_v0  ;;  %92 = vst.msk [vmem:[#allocation2 + $0x68] sm:$0xff] %vm78_vm0, %v891_v0  ;;  %v132_v1 = vld [vmem:[%s970_s17] sm:$0xff] (!%p737_p2)  ;;  %v133_v2 = vld [vmem:[%s970_s17 + $0x8] sm:$0xff] (!%p737_p2)  ;;  %813 = vmatprep.mubr.bf16.mxu0 (!%p737_p2), %v881_v12 }
   0x8   :  { %93 = vst.msk [vmem:[#allocation2 + $0x70] sm:$0xff] %vm78_vm0, %v891_v0  ;;  %94 = vst.msk [vmem:[#allocation2 + $0x78] sm:$0xff] %vm78_vm0, %v891_v0  ;;  %v134_v3 = vld [vmem:[%s970_s17 + $0x10] sm:$0xff] (!%p737_p2)  ;;  %v148_v4 = vpack.c.bf16 (!%p737_p2), %v133_v2, %v132_v1  ;;  %v135_v5 = vld [vmem:[%s970_s17 + $0x18] sm:$0xff] (!%p737_p2) }
   0x9   :  { %v149_v6 = vpack.c.bf16 (!%p737_p2), %v135_v5, %v134_v3  ;;  %v136_v7 = vld [vmem:[%s970_s17 + $0x20] sm:$0xff] (!%p737_p2)  ;;  %v137_v8 = vld [vmem:[%s970_s17 + $0x28] sm:$0xff] (!%p737_p2)  ;;  %v138_v9 = vld [vmem:[%s970_s17 + $0x30] sm:$0xff] (!%p737_p2) }
   0xa   :  { %797 = vmatprep.subr.bf16.mxu0 (!%p737_p2), %v148_v4  ;;  %861 = vmatprep.subr.bf16.mxu1 (!%p737_p2), %v148_v4  ;;  %v150_v10 = vpack.c.bf16 (!%p737_p2), %v137_v8, %v136_v7  ;;  %v139_v11 = vld [vmem:[%s970_s17 + $0x38] sm:$0xff] (!%p737_p2)  ;;  %v882_v13 = vld [vmem:[%s965_s13 + $0x20] sm:$0xff] (!%p737_p2)   ;;  %v141_v16 = vld [vmem:[%s970_s17 + $0x48] sm:$0xff] (!%p737_p2) }
   0xb   :  { %798 = vmatpush3.bf16.msra.mxu0 (!%p737_p2), %v148_v4  ;;  %869 = vmatpush3.bf16.msra.mxu1 (!%p737_p2), %v148_v4  ;;  %v151_v14 = vpack.c.bf16 (!%p737_p2), %v139_v11, %v138_v9  ;;  %v140_v15 = vld [vmem:[%s970_s17 + $0x40] sm:$0xff] (!%p737_p2)  ;;  %v142_v18 = vld [vmem:[%s970_s17 + $0x50] sm:$0xff] (!%p737_p2)  ;;  %v143_v19 = vld [vmem:[%s970_s17 + $0x58] sm:$0xff] (!%p737_p2) }
   0xc   :  { %799 = vmatprep.subr.bf16.mxu0 (!%p737_p2), %v149_v6  ;;  %862 = vmatprep.subr.bf16.mxu1 (!%p737_p2), %v149_v6  ;;  %v152_v17 = vpack.c.bf16 (!%p737_p2), %v141_v16, %v140_v15  ;;  %v153_v20 = vpack.c.bf16 (!%p737_p2), %v143_v19, %v142_v18  ;;  %v144_v21 = vld [vmem:[%s970_s17 + $0x60] sm:$0xff] (!%p737_p2)  ;;  %v145_v22 = vld [vmem:[%s970_s17 + $0x68] sm:$0xff] (!%p737_p2)  ;;  %v146_v24 = vld [vmem:[%s970_s17 + $0x70] sm:$0xff] (!%p737_p2) }
   0xd   :  { %821 = vmatprep.mubr.bf16.mxu1 %v882_v13  ;;  %v154_v23 = vpack.c.bf16 %v145_v22, %v144_v21  ;;  %v147_v25 = vld [vmem:[%s970_s17 + $0x78] sm:$0xff]  ;;  %v884_v28 = vld [vmem:[%s965_s13 + $0x28] sm:$0xff]   ;;  %v885_v29 = vld [vmem:[%s965_s13 + $0x10] sm:$0xff]  }
   0xe   :  { %v155_v26 = vpack.c.bf16 %v147_v25, %v146_v24  ;;  %v886_v30 = vld [vmem:[%s965_s13 + $0x30] sm:$0xff]   ;;  %v887_v31 = vld [vmem:[%s965_s13 + $0x18] sm:$0xff]   ;;  %v100_v35 = vld [vmem:[#allocation2] sm:$0xff] }
   0xf   :  { %800 = vmatpush3.bf16.msra.mxu0 %v149_v6  ;;  %870 = vmatpush3.bf16.msra.mxu1 %v149_v6  ;;  %v888_v32 = vld [vmem:[%s965_s13 + $0x38] sm:$0xff]   ;;  %v102_v33 = vld [vmem:[#allocation2 + $0x10] sm:$0xff]  ;;  %v108_v36 = vld [vmem:[#allocation2 + $0x40] sm:$0xff] }
  0x10   :  { %801 = vmatprep.subr.bf16.mxu0 %v150_v10  ;;  %863 = vmatprep.subr.bf16.mxu1 %v150_v10  ;;  %v110_v34 = vld [vmem:[#allocation2 + $0x50] sm:$0xff]  ;;  %v103_v39 = vld [vmem:[#allocation2 + $0x18] sm:$0xff]  ;;  %v101_v45 = vld [vmem:[#allocation2 + $0x8] sm:$0xff] }
  0x11   :  { %v111_v40 = vld [vmem:[#allocation2 + $0x58] sm:$0xff]  ;;  %v109_v46 = vld [vmem:[#allocation2 + $0x48] sm:$0xff]  ;;  %v106_v57 = vld [vmem:[#allocation2 + $0x30] sm:$0xff] }
  0x12   :  { %v114_v58 = vld [vmem:[#allocation2 + $0x70] sm:$0xff]  ;;  %v104_v59 = vld [vmem:[#allocation2 + $0x20] sm:$0xff]  ;;  %v107_v63 = vld [vmem:[#allocation2 + $0x38] sm:$0xff] }
  0x13   :  { %802 = vmatpush3.bf16.msra.mxu0 %v150_v10  ;;  %871 = vmatpush3.bf16.msra.mxu1 %v150_v10  ;;  %v112_v60 = vld [vmem:[#allocation2 + $0x60] sm:$0xff]  ;;  %v115_v0 = vld [vmem:[#allocation2 + $0x78] sm:$0xff]  ;;  %v105_v5 = vld [vmem:[#allocation2 + $0x28] sm:$0xff] }
  0x14   :  { %803 = vmatprep.subr.bf16.mxu0 %v151_v14  ;;  %864 = vmatprep.subr.bf16.mxu1 %v151_v14  ;;  %v113_v6 = vld [vmem:[#allocation2 + $0x68] sm:$0xff] }
  0x17   :  { %804 = vmatpush3.bf16.msra.mxu0 %v151_v14  ;;  %872 = vmatpush3.bf16.msra.mxu1 %v151_v14 }
  0x18   :  { %805 = vmatprep.subr.bf16.mxu0 %v152_v17  ;;  %865 = vmatprep.subr.bf16.mxu1 %v152_v17 }
  0x1b   :  { %806 = vmatpush3.bf16.msra.mxu0 %v152_v17  ;;  %873 = vmatpush3.bf16.msra.mxu1 %v152_v17 }
  0x1c   :  { %807 = vmatprep.subr.bf16.mxu0 %v153_v20  ;;  %866 = vmatprep.subr.bf16.mxu1 %v153_v20 }
  0x1f   :  { %808 = vmatpush3.bf16.msra.mxu0 %v153_v20  ;;  %874 = vmatpush3.bf16.msra.mxu1 %v153_v20 }
  0x20   :  { %809 = vmatprep.subr.bf16.mxu0 %v154_v23  ;;  %867 = vmatprep.subr.bf16.mxu1 %v154_v23 }
  0x23   :  { %810 = vmatpush3.bf16.msra.mxu0 %v154_v23  ;;  %875 = vmatpush3.bf16.msra.mxu1 %v154_v23 }
  0x24   :  { %811 = vmatprep.subr.bf16.mxu0 %v155_v26  ;;  %868 = vmatprep.subr.bf16.mxu1 %v155_v26 }
  0x27   :  { %812 = vmatpush3.bf16.msra.mxu0 %v155_v26  ;;  %876 = vmatpush3.bf16.msra.mxu1 %v155_v26 }
  0x2a   :  { %814 = vmatmul.mubr.bf16.vlgmr.msra.gmra.mrb[0].mxu0 %v883_v27  ;;  %822 = vmatmul.mubr.bf16.vlgmr.msra.gmra.mrb[0].mxu1 %v884_v28 }
  0x2b   :  { %817 = vmatprep.mubr.bf16.mxu0 %v885_v29  ;;  %825 = vmatprep.mubr.bf16.mxu1 %v886_v30 }
  0x32   :  { %818 = vmatmul.mubr.bf16.gmra.mrb[4].mxu0 %v887_v31  ;;  %826 = vmatmul.mubr.bf16.gmra.mrb[4].mxu1 %v888_v32 }
  0xfd   :  { %v815_v37 = vpop.f32.mrb[0].mxu0  ;;  %v823_v38 = vpop.f32.mrb[0].mxu1 }
  0xfe   :  { %v303_v41 = vadd.f32 %v815_v37, %v102_v33  ;;  %v311_v42 = vadd.f32 %v823_v38, %v110_v34  ;;  %v238_v43 = vpop.f32.mrb[1].mxu0  ;;  %v270_v44 = vpop.f32.mrb[1].mxu1 }
  0xff   :  { %v301_v47 = vadd.f32 %v238_v43, %v100_v35  ;;  %v309_v48 = vadd.f32 %v270_v44, %v108_v36  ;;  %v816_v49 = vpop.f32.mrb[2].mxu0  ;;  %v824_v50 = vpop.f32.mrb[2].mxu1 }
 0x100   :  { %320 = vst.msk [vmem:[#allocation2 + $0x10] sm:$0xff] %vm78_vm0, %v303_v41  ;;  %328 = vst.msk [vmem:[#allocation2 + $0x50] sm:$0xff] %vm78_vm0, %v311_v42  ;;  %v304_v51 = vadd.f32 %v816_v49, %v103_v39  ;;  %v312_v52 = vadd.f32 %v824_v50, %v111_v40  ;;  %v241_v53 = vpop.f32.mrb[3].mxu0  ;;  %v273_v54 = vpop.f32.mrb[3].mxu1 }
 0x101   :  { %318 = vst.msk [vmem:[#allocation2] sm:$0xff] %vm78_vm0, %v301_v47  ;;  %326 = vst.msk [vmem:[#allocation2 + $0x40] sm:$0xff] %vm78_vm0, %v309_v48  ;;  %v302_v55 = vadd.f32 %v241_v53, %v101_v45  ;;  %v310_v56 = vadd.f32 %v273_v54, %v109_v46 }
 0x102   :  { %321 = vst.msk [vmem:[#allocation2 + $0x18] sm:$0xff] %vm78_vm0, %v304_v51  ;;  %329 = vst.msk [vmem:[#allocation2 + $0x58] sm:$0xff] %vm78_vm0, %v312_v52 }
 0x103   :  { %319 = vst.msk [vmem:[#allocation2 + $0x8] sm:$0xff] %vm78_vm0, %v302_v55  ;;  %327 = vst.msk [vmem:[#allocation2 + $0x48] sm:$0xff] %vm78_vm0, %v310_v56 }
 0x105   :  { %v819_v61 = vpop.f32.mrb[4].mxu0  ;;  %v827_v62 = vpop.f32.mrb[4].mxu1 }
 0x106   :  { %v307_v1 = vadd.f32 %v819_v61, %v106_v57  ;;  %v315_v2 = vadd.f32 %v827_v62, %v114_v58  ;;  %v254_v3 = vpop.f32.mrb[5].mxu0  ;;  %v286_v4 = vpop.f32.mrb[5].mxu1 }
 0x107   :  { %v305_v7 = vadd.f32 %v254_v3, %v104_v59  ;;  %v313_v8 = vadd.f32 %v286_v4, %v112_v60  ;;  %v820_v9 = vpop.f32.mrb[6].mxu0  ;;  %v828_v10 = vpop.f32.mrb[6].mxu1 }
 0x108   :  { %324 = vst.msk [vmem:[#allocation2 + $0x30] sm:$0xff] %vm78_vm0, %v307_v1  ;;  %332 = vst.msk [vmem:[#allocation2 + $0x70] sm:$0xff] %vm78_vm0, %v315_v2  ;;  %v308_v11 = vadd.f32 %v820_v9, %v107_v63  ;;  %v316_v12 = vadd.f32 %v828_v10, %v115_v0  ;;  %v257_v13 = vpop.f32.mrb[7].mxu0  ;;  %v289_v14 = vpop.f32.mrb[7].mxu1 }
 0x109   :  { %322 = vst.msk [vmem:[#allocation2 + $0x20] sm:$0xff] %vm78_vm0, %v305_v7  ;;  %330 = vst.msk [vmem:[#allocation2 + $0x60] sm:$0xff] %vm78_vm0, %v313_v8  ;;  %v306_v15 = vadd.f32 %v257_v13, %v105_v5  ;;  %v314_v16 = vadd.f32 %v289_v14, %v113_v6 }
 0x10a   :  { %325 = vst.msk [vmem:[#allocation2 + $0x38] sm:$0xff] %vm78_vm0, %v308_v11  ;;  %333 = vst.msk [vmem:[#allocation2 + $0x78] sm:$0xff] %vm78_vm0, %v316_v12 }
 0x10b   :  { %323 = vst.msk [vmem:[#allocation2 + $0x28] sm:$0xff] %vm78_vm0, %v306_v15  ;;  %331 = vst.msk [vmem:[#allocation2 + $0x68] sm:$0xff] %vm78_vm0, %v314_v16 }
 0x10c PF:  { %v354_v17 = vld [vmem:[%s1236_s4 + $0x8] sm:$0xff]  ;;  %v353_v18 = vld [vmem:[%s1236_s4] sm:$0xff]  ;;  %v892_v19 = vmov 0   ;;  %v363_v25 = vld [vmem:[%s1236_s4 + $0x50] sm:$0xff]  ;;  %vm700_vm1 = vcmask 261120  }
 0x10d   :  { %890 = vset.pattern.permute.xlu1 %v892_v19  ;;  %889 = vset.pattern.permute.xlu0 %v892_v19  ;;  %v362_v20 = vld [vmem:[%s1236_s4 + $0x48] sm:$0xff]  ;;  %v361_v21 = vld [vmem:[%s1236_s4 + $0x40] sm:$0xff]  ;;  %v355_v26 = vld [vmem:[%s1236_s4 + $0x10] sm:$0xff] }
 0x10e   :  { %376 = vperm.xlu1 %890, %v354_v17   ;;  %371 = vperm.xlu0 %889, %v353_v18   ;;  %v465_v22 = vld [vmem:[%s1237_s5] sm:$0xff]  ;;  %v466_v23 = vld [vmem:[%s1237_s5 + $0x8] sm:$0xff]  ;;  %v364_v27 = vld [vmem:[%s1236_s4 + $0x58] sm:$0xff] }
 0x10f   :  { %v857_v24 = vpack.c.bf16 %v466_v23, %v465_v22  ;;  %v356_v28 = vld [vmem:[%s1236_s4 + $0x18] sm:$0xff]  ;;  %v365_v29 = vld [vmem:[%s1236_s4 + $0x60] sm:$0xff]  ;;  %v366_v31 = vld [vmem:[%s1236_s4 + $0x68] sm:$0xff] }
 0x110   :  { %v357_v30 = vld [vmem:[%s1236_s4 + $0x20] sm:$0xff]  ;;  %v358_v32 = vld [vmem:[%s1236_s4 + $0x28] sm:$0xff]  ;;  %v367_v33 = vld [vmem:[%s1236_s4 + $0x70] sm:$0xff] }
 0x111   :  { %858 = vmatprep.subr.bf16.mxu0 %v857_v24  ;;  %877 = vmatprep.subr.bf16.mxu1 %v857_v24  ;;  %v359_v34 = vld [vmem:[%s1236_s4 + $0x30] sm:$0xff]  ;;  %v368_v35 = vld [vmem:[%s1236_s4 + $0x78] sm:$0xff]  ;;  %v338_v37 = vld [vmem:[#allocation2 + $0x8] sm:$0xff] }
 0x112   :  { %416 = vperm.xlu1 %890, %v362_v20   ;;  %411 = vperm.xlu0 %889, %v361_v21   ;;  %v360_v36 = vld [vmem:[%s1236_s4 + $0x38] sm:$0xff]  ;;  %v337_v38 = vld [vmem:[#allocation2] sm:$0xff]  ;;  %v346_v43 = vld [vmem:[#allocation2 + $0x48] sm:$0xff] }
 0x113   :  { %860 = vmatpush3.bf16.msra.mxu0 %v857_v24  ;;  %878 = vmatpush3.bf16.msra.mxu1 %v857_v24  ;;  %v345_v44 = vld [vmem:[#allocation2 + $0x40] sm:$0xff]  ;;  %v347_v49 = vld [vmem:[#allocation2 + $0x50] sm:$0xff]  ;;  %v348_v55 = vld [vmem:[#allocation2 + $0x58] sm:$0xff] }
 0x114   :  { %v339_v50 = vld [vmem:[#allocation2 + $0x10] sm:$0xff]  ;;  %v340_v56 = vld [vmem:[#allocation2 + $0x18] sm:$0xff]  ;;  %v349_v61 = vld [vmem:[#allocation2 + $0x60] sm:$0xff] }
 0x115   :  { %v341_v62 = vld [vmem:[#allocation2 + $0x20] sm:$0xff]  ;;  %v350_v3 = vld [vmem:[#allocation2 + $0x68] sm:$0xff]  ;;  %v351_v9 = vld [vmem:[#allocation2 + $0x70] sm:$0xff] }
 0x116   :  { %421 = vperm.xlu1 %890, %v363_v25   ;;  %381 = vperm.xlu0 %889, %v355_v26   ;;  %v342_v4 = vld [vmem:[#allocation2 + $0x28] sm:$0xff]  ;;  %v343_v10 = vld [vmem:[#allocation2 + $0x30] sm:$0xff]  ;;  %v352_v15 = vld [vmem:[#allocation2 + $0x78] sm:$0xff] }
 0x117   :  { %v344_v16 = vld [vmem:[#allocation2 + $0x38] sm:$0xff]  ;;  %v1136_v21 = vld [vmem:[%s1238_s6] ss:$0 sm:$0xff] }
 0x11a   :  { %426 = vperm.xlu1 %890, %v364_v27   ;;  %386 = vperm.xlu0 %889, %v356_v28  }
 0x11e   :  { %431 = vperm.xlu1 %890, %v365_v29   ;;  %391 = vperm.xlu0 %889, %v357_v30  }
 0x122   :  { %436 = vperm.xlu1 %890, %v366_v31   ;;  %396 = vperm.xlu0 %889, %v358_v32  }
 0x126   :  { %441 = vperm.xlu1 %890, %v367_v33   ;;  %401 = vperm.xlu0 %889, %v359_v34  }
 0x12a   :  { %446 = vperm.xlu1 %890, %v368_v35   ;;  %406 = vperm.xlu0 %889, %v360_v36  }
 0x18d   :  { %v1069_v39 = vpop.permute.xlu1 %376  ;;  %v1071_v40 = vpop.permute.xlu0 %371 }
 0x18e   :  { %v450_v41 = vmul.f32 %v1069_v39, %v338_v37  ;;  %v449_v42 = vmul.f32 %v1071_v40, %v337_v38 }
 0x190   :  { %833 = vmatprep.mubr.msk.f32.mxu0 %vm78_vm0, %v449_v42 }
 0x191   :  { %v1076_v45 = vpop.permute.xlu1 %416  ;;  %v1078_v46 = vpop.permute.xlu0 %411  ;;  %834 = vmatmul.mubr.msk.f32.vlgmr.msra.gmra.mrb[0].mxu0 %vm78_vm0, %v450_v41 }
 0x192   :  { %v458_v47 = vmul.f32 %v1076_v45, %v346_v43  ;;  %v457_v48 = vmul.f32 %v1078_v46, %v345_v44 }
 0x194   :  { %845 = vmatprep.mubr.msk.f32.mxu1 %vm78_vm0, %v457_v48 }
 0x195   :  { %v1084_v51 = vpop.permute.xlu1 %421  ;;  %v1086_v52 = vpop.permute.xlu0 %381  ;;  %846 = vmatmul.mubr.msk.f32.vlgmr.msra.gmra.mrb[0].mxu1 %vm78_vm0, %v458_v47 }
 0x196   :  { %v459_v53 = vmul.f32 %v1084_v51, %v347_v49  ;;  %v451_v54 = vmul.f32 %v1086_v52, %v339_v50 }
 0x198   :  { %836 = vmatprep.mubr.msk.f32.mxu0 %vm78_vm0, %v451_v54  ;;  %848 = vmatprep.mubr.msk.f32.mxu1 %vm78_vm0, %v459_v53 }
 0x199   :  { %v1093_v57 = vpop.permute.xlu1 %426  ;;  %v1095_v58 = vpop.permute.xlu0 %386 }
 0x19a   :  { %v460_v59 = vmul.f32 %v1093_v57, %v348_v55  ;;  %v452_v60 = vmul.f32 %v1095_v58, %v340_v56 }
 0x19c   :  { %837 = vmatmul.mubr.msk.f32.gmra.mrb[2].mxu0 %vm78_vm0, %v452_v60  ;;  %849 = vmatmul.mubr.msk.f32.gmra.mrb[2].mxu1 %vm78_vm0, %v460_v59 }
 0x19d   :  { %v1101_v63 = vpop.permute.xlu1 %431  ;;  %v1103_v0 = vpop.permute.xlu0 %391 }
 0x19e   :  { %v461_v1 = vmul.f32 %v1101_v63, %v349_v61  ;;  %v453_v2 = vmul.f32 %v1103_v0, %v341_v62 }
 0x1a0   :  { %839 = vmatprep.mubr.msk.f32.mxu0 %vm78_vm0, %v453_v2  ;;  %851 = vmatprep.mubr.msk.f32.mxu1 %vm78_vm0, %v461_v1 }
 0x1a1   :  { %v1109_v5 = vpop.permute.xlu1 %436  ;;  %v1111_v6 = vpop.permute.xlu0 %396 }
 0x1a2   :  { %v462_v7 = vmul.f32 %v1109_v5, %v350_v3  ;;  %v454_v8 = vmul.f32 %v1111_v6, %v342_v4 }
 0x1a4   :  { %840 = vmatmul.mubr.msk.f32.gmra.mrb[4].mxu0 %vm78_vm0, %v454_v8  ;;  %852 = vmatmul.mubr.msk.f32.gmra.mrb[4].mxu1 %vm78_vm0, %v462_v7 }
 0x1a5   :  { %v1117_v11 = vpop.permute.xlu1 %441  ;;  %v1119_v12 = vpop.permute.xlu0 %401 }
 0x1a6   :  { %v463_v13 = vmul.f32 %v1117_v11, %v351_v9  ;;  %v455_v14 = vmul.f32 %v1119_v12, %v343_v10 }
 0x1a8   :  { %842 = vmatprep.mubr.msk.f32.mxu0 %vm78_vm0, %v455_v14  ;;  %854 = vmatprep.mubr.msk.f32.mxu1 %vm78_vm0, %v463_v13 }
 0x1a9   :  { %v1125_v17 = vpop.permute.xlu1 %446  ;;  %v1127_v18 = vpop.permute.xlu0 %406 }
 0x1aa   :  { %v464_v19 = vmul.f32 %v1125_v17, %v352_v15  ;;  %v456_v20 = vmul.f32 %v1127_v18, %v344_v16 }
 0x1ac   :  { %843 = vmatmul.mubr.msk.f32.gmra.mrb[6].mxu0 %vm78_vm0, %v456_v20  ;;  %855 = vmatmul.mubr.msk.f32.gmra.mrb[6].mxu1 %vm78_vm0, %v464_v19 }
 0x264   :  { %v835_v22 = vpop.f32.mrb[0].mxu0 }
 0x265   :  { %v595_v23 = vadd.f32 %v835_v22, %v1136_v21  ;;  %v589_v24 = vpop.f32.mrb[1].mxu0 }
 0x266   :  { %v590_v25 = vadd.f32 %v1136_v21, %v589_v24 }
 0x267   :  { %v669_v26 = vmax.f32 %v595_v23, 0.0 }
 0x268   :  { %v668_v27 = vmax.f32 %v590_v25, 0.0  ;;  %v847_v28 = vpop.f32.mrb[0].mxu1 }
 0x269   :  { %v685_v29 = vmul.f32 %v669_v26, %v1069_v39  ;;  %v635_v30 = vadd.f32 %v847_v28, %v1136_v21  ;;  %v629_v31 = vpop.f32.mrb[1].mxu1 }
 0x26a   :  { %v684_v32 = vmul.f32 %v668_v27, %v1071_v40  ;;  %v630_v33 = vadd.f32 %v1136_v21, %v629_v31 }
 0x26b   :  { %702 = vst.msk [vmem:[%s1239_s7 + $0x8] sm:$0xff] %vm700_vm1, %v685_v29  ;;  %v677_v34 = vmax.f32 %v635_v30, 0.0 }
 0x26c   :  { %701 = vst.msk [vmem:[%s1239_s7] sm:$0xff] %vm700_vm1, %v684_v32  ;;  %v676_v35 = vmax.f32 %v630_v33, 0.0 }
 0x26d   :  { %v693_v36 = vmul.f32 %v677_v34, %v1076_v45 }
 0x26e   :  { %v692_v37 = vmul.f32 %v676_v35, %v1078_v46 }
 0x26f   :  { %710 = vst.msk [vmem:[%s1239_s7 + $0x48] sm:$0xff] %vm700_vm1, %v693_v36  ;;  %v838_v38 = vpop.f32.mrb[2].mxu0  ;;  %v850_v39 = vpop.f32.mrb[2].mxu1 }
 0x270   :  { %709 = vst.msk [vmem:[%s1239_s7 + $0x40] sm:$0xff] %vm700_vm1, %v692_v37  ;;  %v605_v40 = vadd.f32 %v838_v38, %v1136_v21  ;;  %v645_v41 = vadd.f32 %v850_v39, %v1136_v21  ;;  %v599_v42 = vpop.f32.mrb[3].mxu0  ;;  %v639_v43 = vpop.f32.mrb[3].mxu1 }
 0x271   :  { %v600_v44 = vadd.f32 %v1136_v21, %v599_v42  ;;  %v640_v45 = vadd.f32 %v1136_v21, %v639_v43 }
 0x272   :  { %v671_v46 = vmax.f32 %v605_v40, 0.0  ;;  %v679_v47 = vmax.f32 %v645_v41, 0.0 }
 0x273   :  { %v670_v48 = vmax.f32 %v600_v44, 0.0  ;;  %v678_v49 = vmax.f32 %v640_v45, 0.0 }
 0x274   :  { %v687_v50 = vmul.f32 %v671_v46, %v1095_v58  ;;  %v695_v53 = vmul.f32 %v679_v47, %v1093_v57 }
 0x275   :  { %v686_v54 = vmul.f32 %v670_v48, %v1086_v52  ;;  %v694_v55 = vmul.f32 %v678_v49, %v1084_v51 }
 0x276   :  { %704 = vst.msk [vmem:[%s1239_s7 + $0x18] sm:$0xff] %vm700_vm1, %v687_v50  ;;  %712 = vst.msk [vmem:[%s1239_s7 + $0x58] sm:$0xff] %vm700_vm1, %v695_v53 }
 0x277   :  { %703 = vst.msk [vmem:[%s1239_s7 + $0x10] sm:$0xff] %vm700_vm1, %v686_v54  ;;  %711 = vst.msk [vmem:[%s1239_s7 + $0x50] sm:$0xff] %vm700_vm1, %v694_v55  ;;  %v841_v51 = vpop.f32.mrb[4].mxu0  ;;  %v853_v52 = vpop.f32.mrb[4].mxu1 }
 0x278   :  { %v615_v56 = vadd.f32 %v841_v51, %v1136_v21  ;;  %v655_v57 = vadd.f32 %v853_v52, %v1136_v21  ;;  %v609_v58 = vpop.f32.mrb[5].mxu0  ;;  %v649_v59 = vpop.f32.mrb[5].mxu1 }
 0x279   :  { %v610_v60 = vadd.f32 %v1136_v21, %v609_v58  ;;  %v650_v61 = vadd.f32 %v1136_v21, %v649_v59 }
 0x27a   :  { %v673_v62 = vmax.f32 %v615_v56, 0.0  ;;  %v681_v1 = vmax.f32 %v655_v57, 0.0 }
 0x27b   :  { %v672_v2 = vmax.f32 %v610_v60, 0.0  ;;  %v680_v3 = vmax.f32 %v650_v61, 0.0 }
 0x27c   :  { %v689_v4 = vmul.f32 %v673_v62, %v1111_v6  ;;  %v697_v7 = vmul.f32 %v681_v1, %v1109_v5 }
 0x27d   :  { %v688_v8 = vmul.f32 %v672_v2, %v1103_v0  ;;  %v696_v9 = vmul.f32 %v680_v3, %v1101_v63 }
 0x27e   :  { %706 = vst.msk [vmem:[%s1239_s7 + $0x28] sm:$0xff] %vm700_vm1, %v689_v4  ;;  %714 = vst.msk [vmem:[%s1239_s7 + $0x68] sm:$0xff] %vm700_vm1, %v697_v7 }
 0x27f   :  { %705 = vst.msk [vmem:[%s1239_s7 + $0x20] sm:$0xff] %vm700_vm1, %v688_v8  ;;  %713 = vst.msk [vmem:[%s1239_s7 + $0x60] sm:$0xff] %vm700_vm1, %v696_v9  ;;  %v844_v63 = vpop.f32.mrb[6].mxu0  ;;  %v856_v0 = vpop.f32.mrb[6].mxu1 }
 0x280   :  { %v625_v5 = vadd.f32 %v844_v63, %v1136_v21  ;;  %v665_v6 = vadd.f32 %v856_v0, %v1136_v21  ;;  %v619_v10 = vpop.f32.mrb[7].mxu0  ;;  %v659_v13 = vpop.f32.mrb[7].mxu1 }
 0x281   :  { %v620_v14 = vadd.f32 %v1136_v21, %v619_v10  ;;  %v660_v15 = vadd.f32 %v1136_v21, %v659_v13 }
 0x282   :  { %v675_v16 = vmax.f32 %v625_v5, 0.0  ;;  %v683_v19 = vmax.f32 %v665_v6, 0.0 }
 0x283   :  { %v674_v20 = vmax.f32 %v620_v14, 0.0  ;;  %v682_v22 = vmax.f32 %v660_v15, 0.0 }
 0x284   :  { %v691_v23 = vmul.f32 %v675_v16, %v1127_v18  ;;  %v699_v24 = vmul.f32 %v683_v19, %v1125_v17 }
 0x285   :  { %v690_v25 = vmul.f32 %v674_v20, %v1119_v12  ;;  %v698_v26 = vmul.f32 %v682_v22, %v1117_v11 }
 0x286   :  { %708 = vst.msk [vmem:[%s1239_s7 + $0x38] sm:$0xff] %vm700_vm1, %v691_v23  ;;  %716 = vst.msk [vmem:[%s1239_s7 + $0x78] sm:$0xff] %vm700_vm1, %v699_v24 }
 0x287   :  { %707 = vst.msk [vmem:[%s1239_s7 + $0x30] sm:$0xff] %vm700_vm1, %v690_v25  ;;  %715 = vst.msk [vmem:[%s1239_s7 + $0x70] sm:$0xff] %vm700_vm1, %v698_v26 }

</bundles_post_ra>
